<compile_context>
chip_gen: v7x
topology: tpu7x:2x2x1
jax: 0.10.0
libtpu: 0.0.40
codegen_flags: <defaults>
</compile_context>

<pallas_src>
import math
import functools

import jax
import jax.numpy as jnp
from jax.experimental import pallas as pl
from jax.experimental.pallas import tpu as pltpu


# ----------------------------- Fused model kernel -----------------------------

def _model_kernel(x_ref, pe_ref,
                  wqkv_ref, bqkv_ref, wo_ref, bo_ref,
                  ln1g_ref, ln1b_ref, ff1w_ref, ff1b_ref,
                  ff2w_ref, ff2b_ref, ln2g_ref, ln2b_ref,
                  encg_ref, encb_ref,
                  c1w_ref, c1b_ref, c2w_ref, c2b_ref,
                  o_ref, *, nhead, concat_type, eps=1e-5):
    S, D = x_ref.shape
    L = wqkv_ref.shape[0]
    Dh = D // nhead

    def mm(a, w):
        # bf16 operands on the MXU, f32 accumulation.
        return jnp.dot(a.astype(jnp.bfloat16), w.astype(jnp.bfloat16),
                       preferred_element_type=jnp.float32)

    def bmm(eq, a, b):
        # head-batched matmul (leading batch dim), bf16 -> f32 acc.
        return jnp.einsum(eq, a.astype(jnp.bfloat16), b.astype(jnp.bfloat16),
                          preferred_element_type=jnp.float32)

    def layer_norm(v, g, b):
        # var = E[x^2] - mu^2 -> two *independent* lane reductions.
        mu = jnp.mean(v, axis=-1, keepdims=True)
        ms = jnp.mean(v * v, axis=-1, keepdims=True)
        return (v - mu) * jax.lax.rsqrt(ms - mu * mu + eps) * g + b

    # positional encoding (dropout = eval no-op)
    x = x_ref[...] + pe_ref[...]                                   # (S, D) f32

    for l in range(L):
        # ---------------- multi-head self-attention (head-batched) ----------
        # 1/sqrt(Dh) is pre-folded into the Q columns of wqkv/bqkv.
        qkv = mm(x, wqkv_ref[l]) + bqkv_ref[l]                     # (S, 3D) f32
        q = qkv[:, 0:D]
        k = qkv[:, D:2 * D]
        v = qkv[:, 2 * D:3 * D]
        qh = jnp.stack([q[:, h * Dh:(h + 1) * Dh] for h in range(nhead)], axis=0)
        kh = jnp.stack([k[:, h * Dh:(h + 1) * Dh] for h in range(nhead)], axis=0)
        vh = jnp.stack([v[:, h * Dh:(h + 1) * Dh] for h in range(nhead)], axis=0)
        # (H, S, S) scores, one batched dot_general.
        s = bmm('hqd,hkd->hqk', qh, kh)
        m = jnp.max(s, axis=-1, keepdims=True)
        p = jnp.exp(s - m)
        p = p * pl.reciprocal(jnp.sum(p, axis=-1, keepdims=True), approx=True)
        oh = bmm('hqk,hkd->hqd', p, vh)                            # (H, S, Dh)
        # recombine heads on the lane dim, then ONE K=D output projection.
        o_cat = jnp.concatenate([oh[h] for h in range(nhead)], axis=-1)  # (S, D)
        attn = mm(o_cat, wo_ref[l]) + bo_ref[l]
        x = layer_norm(x + attn, ln1g_ref[l], ln1b_ref[l])         # post-norm

        # ---------------- feed-forward (relu) ----------------
        hdn = jnp.maximum(mm(x, ff1w_ref[l]) + ff1b_ref[l], 0.0)   # (S, F)
        ff = mm(hdn, ff2w_ref[l]) + ff2b_ref[l]                    # (S, D)
        x = layer_norm(x + ff, ln2g_ref[l], ln2b_ref[l])

    # encoder output norm
    x = layer_norm(x, encg_ref[...], encb_ref[...])                # (S, D)

    # sequence pooling
    if concat_type == "sum":
        mem = jnp.sum(x, axis=0, keepdims=True)                    # (1, D)
    elif concat_type == "avg":
        mem = jnp.sum(x, axis=0, keepdims=True) * (1.0 / S)
    else:
        mem = x[S - 1:S, :]

    # fused classifier (Linear -> Dropout(eval) -> Linear)
    hcls = mm(mem, c1w_ref[...]) + c1b_ref[...]                    # (1, C1)
    out = mm(hcls, c2w_ref[...]) + c2b_ref[...]                    # (1, C2)
    o_ref[...] = out.astype(o_ref.dtype)


_WEIGHT_ORDER = ("wqkv", "bqkv", "wo", "bo", "ln1g", "ln1b",
                 "ff1w", "ff1b", "ff2w", "ff2b", "ln2g", "ln2b",
                 "encg", "encb", "c1w", "c1b", "c2w", "c2b")


def _resident_spec(arr):
    """Full-array block, constant index map -> stays resident in VMEM."""
    zeros = (0,) * arr.ndim
    return pl.BlockSpec(arr.shape, lambda b, _z=zeros: _z)


@functools.partial(jax.jit, static_argnames=("nhead", "concat_type"))
def forward(src, pe, params, nhead, concat_type="sum"):
    """src: (S, B, d_model) in its native layout -> (B, num_classification)."""
    S, B, D = src.shape
    C2 = params["c2w"].shape[-1]

    # Merge the two minor dims: a bitcast for a row-major array (no transpose,
    # no extra HBM round trip).  Lane block b then covers exactly src[:, b, :].
    src_flat = src.reshape(S, B * D)                               # (S, B*D)
    weight_args = [params[k] for k in _WEIGHT_ORDER]

    in_specs = [pl.BlockSpec((S, D), lambda b: (0, b)),            # batch elem b
                pl.BlockSpec((S, D), lambda b: (0, 0))]            # pos encoding
    in_specs += [_resident_spec(a) for a in weight_args]

    kernel = functools.partial(_model_kernel, nhead=nhead, concat_type=concat_type)
    out = pl.pallas_call(
        kernel,
        out_shape=jax.ShapeDtypeStruct((B, 1, C2), jnp.float32),
        grid=(B,),
        in_specs=in_specs,
        out_specs=pl.BlockSpec((None, 1, C2), lambda b: (b, 0, 0)),
        compiler_params=pltpu.CompilerParams(
            dimension_semantics=("parallel",)),                    # 2 TCs on v7x
    )(src_flat, pe, *weight_args)
    return out.reshape(B, C2)


# ----------------------------- Params / pos-enc -----------------------------

def positional_encoding(S, D):
    """Standard sinusoidal PE, shape (S, D). Computed once, outside forward."""
    pos = jnp.arange(S, dtype=jnp.float32)[:, None]
    div = jnp.exp(jnp.arange(0, D, 2, dtype=jnp.float32) * (-math.log(10000.0) / D))
    pe = jnp.zeros((S, D), jnp.float32)
    pe = pe.at[:, 0::2].set(jnp.sin(pos * div))
    pe = pe.at[:, 1::2].set(jnp.cos(pos * div))
    return pe


def init_params(key, d_model, nhead, num_layers, dim_ff, dim_cls, num_cls):
    """Raw (PyTorch-style) params: matmul weights stacked per layer in bf16,
    biases / LayerNorm params in f32."""
    def dense(k, fan_in, fan_out):
        kw, kb = jax.random.split(k)
        w = (jax.random.normal(kw, (fan_in, fan_out), jnp.float32) * 0.02)
        b = jax.random.normal(kb, (1, fan_out), jnp.float32) * 0.02
        return w.astype(jnp.bfloat16), b

    keys = jax.random.split(key, num_layers * 4 + 2)
    wqkv, bqkv, wo, bo = [], [], [], []
    ff1w, ff1b, ff2w, ff2b = [], [], [], []
    for i in range(num_layers):
        k0, k1, k2, k3 = keys[i * 4:(i + 1) * 4]
        w, b = dense(k0, d_model, 3 * d_model); wqkv.append(w); bqkv.append(b)
        w, b = dense(k1, d_model, d_model);     wo.append(w);   bo.append(b)
        w, b = dense(k2, d_model, dim_ff);      ff1w.append(w); ff1b.append(b)
        w, b = dense(k3, dim_ff, d_model);      ff2w.append(w); ff2b.append(b)

    ones = jnp.ones((num_layers, 1, d_model), jnp.float32)
    zeros = jnp.zeros((num_layers, 1, d_model), jnp.float32)
    c1w, c1b = dense(keys[-2], d_model, dim_cls)
    c2w, c2b = dense(keys[-1], dim_cls, num_cls)
    return dict(
        wqkv=jnp.stack(wqkv), bqkv=jnp.stack(bqkv),
        wo=jnp.stack(wo), bo=jnp.stack(bo),
        ff1w=jnp.stack(ff1w), ff1b=jnp.stack(ff1b),
        ff2w=jnp.stack(ff2w), ff2b=jnp.stack(ff2b),
        ln1g=ones, ln1b=zeros, ln2g=ones, ln2b=zeros,
        encg=jnp.ones((1, d_model), jnp.float32),
        encb=jnp.zeros((1, d_model), jnp.float32),
        c1w=c1w, c1b=c1b, c2w=c2w, c2b=c2b)


def prepare_params(params, d_model, nhead):
    """One-time, off-the-hot-path prep: fold the 1/sqrt(Dh) attention scale into
    the Q columns of the fused QKV projection (weight AND bias)."""
    scale = 1.0 / math.sqrt(d_model // nhead)
    wqkv = params["wqkv"].astype(jnp.float32)
    wqkv = wqkv.at[:, :, :d_model].multiply(scale)
    bqkv = params["bqkv"].at[:, :, :d_model].multiply(scale)
    out = dict(params)
    out["wqkv"] = wqkv.astype(jnp.bfloat16)
    out["bqkv"] = bqkv
    return out


# ----------------------------- Pure-JAX reference -----------------------------

def reference_forward(src, pe, params, nhead, concat_type="sum"):
    """Reference on the RAW params (explicit 1/sqrt(Dh) on the scores)."""
    S, B, D = src.shape
    L = params["wqkv"].shape[0]
    Dh = D // nhead
    f32 = lambda a: a.astype(jnp.float32)

    def ln(v, g, b, eps=1e-5):
        mu = jnp.mean(v, -1, keepdims=True)
        var = jnp.mean((v - mu) ** 2, -1, keepdims=True)
        return (v - mu) / jnp.sqrt(var + eps) * g + b

    x = src + pe[:, None, :]
    for l in range(L):
        qkv = jnp.einsum("sbd,de->sbe", x, f32(params["wqkv"][l])) + params["bqkv"][l][0]
        q, k, v = jnp.split(qkv, 3, axis=-1)
        q = q.reshape(S, B, nhead, Dh)
        k = k.reshape(S, B, nhead, Dh)
        v = v.reshape(S, B, nhead, Dh)
        s = jnp.einsum("sbhd,tbhd->bhst", q, k) / math.sqrt(Dh)
        p = jax.nn.softmax(s, axis=-1)
        o = jnp.einsum("bhst,tbhd->sbhd", p, v).reshape(S, B, D)
        attn = jnp.einsum("sbd,de->sbe", o, f32(params["wo"][l])) + params["bo"][l][0]
        x = ln(x + attn, params["ln1g"][l][0], params["ln1b"][l][0])
        h = jnp.maximum(
            jnp.einsum("sbd,df->sbf", x, f32(params["ff1w"][l])) + params["ff1b"][l][0], 0.0)
        ff = jnp.einsum("sbf,fd->sbd", h, f32(params["ff2w"][l])) + params["ff2b"][l][0]
        x = ln(x + ff, params["ln2g"][l][0], params["ln2b"][l][0])
    x = ln(x, params["encg"][0], params["encb"][0])
    if concat_type == "sum":
        mem = jnp.sum(x, axis=0)
    elif concat_type == "avg":
        mem = jnp.mean(x, axis=0)
    else:
        mem = x[-1]
    h = mem @ f32(params["c1w"]) + params["c1b"][0]
    return h @ f32(params["c2w"]) + params["c2b"][0]


# ----------------------------- Main -----------------------------

if __name__ == "__main__":
    S, B = 8, 2
    d_model, nhead, num_layers, dim_ff = 128, 4, 2, 256
    dim_cls, num_cls = 64, 4

    key = jax.random.PRNGKey(0)
    kp, kx = jax.random.split(key)
    params = init_params(kp, d_model, nhead, num_layers, dim_ff, dim_cls, num_cls)
    kernel_params = prepare_params(params, d_model, nhead)   # one-time scale fold
    src = jax.random.normal(kx, (S, B, d_model), dtype=jnp.float32)
    pe = positional_encoding(S, d_model)

    out = forward(src, pe, kernel_params, nhead=nhead, concat_type="sum")
    out = jax.block_until_ready(out)

    assert out.shape == (B, num_cls), out.shape
    assert bool(jnp.all(jnp.isfinite(out)))

    ref = reference_forward(src, pe, params, nhead, concat_type="sum")
    max_err = float(jnp.max(jnp.abs(out - ref)))
    assert bool(jnp.allclose(out, ref, atol=1e-1, rtol=1e-1)), max_err

    print("KERNEL_OK")
</pallas_src>

<mosaic_0001>
module attributes {stable_mosaic.version = 11 : i64} {
  func.func @_model_kernel(%arg0: i32, %arg1: memref<8x128xf32, #tpu.memory_space<vmem>>, %arg2: memref<8x128xf32, #tpu.memory_space<vmem>>, %arg3: memref<2x128x384xbf16, #tpu.memory_space<vmem>>, %arg4: memref<2x1x384xf32, #tpu.memory_space<vmem>>, %arg5: memref<2x128x128xbf16, #tpu.memory_space<vmem>>, %arg6: memref<2x1x128xf32, #tpu.memory_space<vmem>>, %arg7: memref<2x1x128xf32, #tpu.memory_space<vmem>>, %arg8: memref<2x1x128xf32, #tpu.memory_space<vmem>>, %arg9: memref<2x128x256xbf16, #tpu.memory_space<vmem>>, %arg10: memref<2x1x256xf32, #tpu.memory_space<vmem>>, %arg11: memref<2x256x128xbf16, #tpu.memory_space<vmem>>, %arg12: memref<2x1x128xf32, #tpu.memory_space<vmem>>, %arg13: memref<2x1x128xf32, #tpu.memory_space<vmem>>, %arg14: memref<2x1x128xf32, #tpu.memory_space<vmem>>, %arg15: memref<1x128xf32, #tpu.memory_space<vmem>>, %arg16: memref<1x128xf32, #tpu.memory_space<vmem>>, %arg17: memref<128x64xbf16, #tpu.memory_space<vmem>>, %arg18: memref<1x64xf32, #tpu.memory_space<vmem>>, %arg19: memref<64x4xbf16, #tpu.memory_space<vmem>>, %arg20: memref<1x4xf32, #tpu.memory_space<vmem>>, %arg21: memref<1x1x4xf32, #tpu.memory_space<vmem>>) attributes {dimension_semantics = [#tpu.dimension_semantics<parallel>], iteration_bounds = array<i64: 2>, scalar_prefetch = 0 : i64, scratch_operands = 0 : i64, tpu.core_type = #tpu.core_type<tc>, window_params = [{transform_indices = @transform_0, window_bounds = array<i64: 8, 128>}, {pipeline_mode = #tpu.pipeline_mode<synchronous>, transform_indices = @transform_1, window_bounds = array<i64: 8, 128>}, {pipeline_mode = #tpu.pipeline_mode<synchronous>, transform_indices = @transform_2, window_bounds = array<i64: 2, 128, 384>}, {pipeline_mode = #tpu.pipeline_mode<synchronous>, transform_indices = @transform_3, window_bounds = array<i64: 2, 1, 384>}, {pipeline_mode = #tpu.pipeline_mode<synchronous>, transform_indices = @transform_4, window_bounds = array<i64: 2, 128, 128>}, {pipeline_mode = #tpu.pipeline_mode<synchronous>, transform_indices = @transform_5, window_bounds = array<i64: 2, 1, 128>}, {pipeline_mode = #tpu.pipeline_mode<synchronous>, transform_indices = @transform_6, window_bounds = array<i64: 2, 1, 128>}, {pipeline_mode = #tpu.pipeline_mode<synchronous>, transform_indices = @transform_7, window_bounds = array<i64: 2, 1, 128>}, {pipeline_mode = #tpu.pipeline_mode<synchronous>, transform_indices = @transform_8, window_bounds = array<i64: 2, 128, 256>}, {pipeline_mode = #tpu.pipeline_mode<synchronous>, transform_indices = @transform_9, window_bounds = array<i64: 2, 1, 256>}, {pipeline_mode = #tpu.pipeline_mode<synchronous>, transform_indices = @transform_10, window_bounds = array<i64: 2, 256, 128>}, {pipeline_mode = #tpu.pipeline_mode<synchronous>, transform_indices = @transform_11, window_bounds = array<i64: 2, 1, 128>}, {pipeline_mode = #tpu.pipeline_mode<synchronous>, transform_indices = @transform_12, window_bounds = array<i64: 2, 1, 128>}, {pipeline_mode = #tpu.pipeline_mode<synchronous>, transform_indices = @transform_13, window_bounds = array<i64: 2, 1, 128>}, {pipeline_mode = #tpu.pipeline_mode<synchronous>, transform_indices = @transform_14, window_bounds = array<i64: 1, 128>}, {pipeline_mode = #tpu.pipeline_mode<synchronous>, transform_indices = @transform_15, window_bounds = array<i64: 1, 128>}, {pipeline_mode = #tpu.pipeline_mode<synchronous>, transform_indices = @transform_16, window_bounds = array<i64: 128, 64>}, {pipeline_mode = #tpu.pipeline_mode<synchronous>, transform_indices = @transform_17, window_bounds = array<i64: 1, 64>}, {pipeline_mode = #tpu.pipeline_mode<synchronous>, transform_indices = @transform_18, window_bounds = array<i64: 64, 4>}, {pipeline_mode = #tpu.pipeline_mode<synchronous>, transform_indices = @transform_19, window_bounds = array<i64: 1, 4>}, {transform_indices = @transform_20, window_bounds = array<i64: 1, 1, 4>}]} {
    %c0 = arith.constant 0 : index
    %c0_0 = arith.constant 0 : index
    %0 = vector.load %arg1[%c0, %c0_0] : memref<8x128xf32, #tpu.memory_space<vmem>>, vector<8x128xf32>
    %c0_1 = arith.constant 0 : index
    %c0_2 = arith.constant 0 : index
    %1 = vector.load %arg2[%c0_1, %c0_2] : memref<8x128xf32, #tpu.memory_space<vmem>>, vector<8x128xf32>
    %2 = arith.addf %0, %1 : vector<8x128xf32>
    %c0_3 = arith.constant 0 : index
    %c0_4 = arith.constant 0 : index
    %c0_5 = arith.constant 0 : index
    %3 = vector.load %arg3[%c0_3, %c0_4, %c0_5] : memref<2x128x384xbf16, #tpu.memory_space<vmem>>, vector<1x128x384xbf16>
    %4 = vector.shape_cast %3 : vector<1x128x384xbf16> to vector<128x384xbf16>
    %5 = arith.truncf %2 : vector<8x128xf32> to vector<8x128xbf16>
    %cst = arith.constant dense<0.000000e+00> : vector<8x384xf32>
    %6 = tpu.matmul %5, %4, %cst {dimension_numbers = #tpu.dot_dimension_numbers<[1], [0], [0], [1], [0, 0, 1, 1], [], []>} : vector<8x128xbf16>, vector<128x384xbf16>, vector<8x384xf32> -> vector<8x384xf32>
    %c0_6 = arith.constant 0 : index
    %c0_7 = arith.constant 0 : index
    %c0_8 = arith.constant 0 : index
    %7 = vector.load %arg4[%c0_6, %c0_7, %c0_8] : memref<2x1x384xf32, #tpu.memory_space<vmem>>, vector<1x1x384xf32>
    %8 = vector.shape_cast %7 : vector<1x1x384xf32> to vector<1x384xf32>
    %9 = vector.broadcast %8 : vector<1x384xf32> to vector<8x384xf32>
    %10 = arith.addf %6, %9 : vector<8x384xf32>
    %11 = vector.extract_strided_slice %10 {offsets = [0, 0], sizes = [8, 128], strides = [1, 1]} : vector<8x384xf32> to vector<8x128xf32>
    %12 = vector.extract_strided_slice %10 {offsets = [0, 128], sizes = [8, 128], strides = [1, 1]} : vector<8x384xf32> to vector<8x128xf32>
    %13 = vector.extract_strided_slice %10 {offsets = [0, 256], sizes = [8, 128], strides = [1, 1]} : vector<8x384xf32> to vector<8x128xf32>
    %14 = vector.extract_strided_slice %11 {offsets = [0, 0], sizes = [8, 32], strides = [1, 1]} : vector<8x128xf32> to vector<8x32xf32>
    %15 = vector.extract_strided_slice %11 {offsets = [0, 32], sizes = [8, 32], strides = [1, 1]} : vector<8x128xf32> to vector<8x32xf32>
    %16 = vector.extract_strided_slice %11 {offsets = [0, 64], sizes = [8, 32], strides = [1, 1]} : vector<8x128xf32> to vector<8x32xf32>
    %17 = vector.extract_strided_slice %11 {offsets = [0, 96], sizes = [8, 32], strides = [1, 1]} : vector<8x128xf32> to vector<8x32xf32>
    %18 = vector.shape_cast %14 : vector<8x32xf32> to vector<1x8x32xf32>
    %19 = vector.shape_cast %15 : vector<8x32xf32> to vector<1x8x32xf32>
    %20 = vector.shape_cast %16 : vector<8x32xf32> to vector<1x8x32xf32>
    %21 = vector.shape_cast %17 : vector<8x32xf32> to vector<1x8x32xf32>
    %22 = tpu.concatenate %18, %19, %20, %21 in 0 : vector<1x8x32xf32>, vector<1x8x32xf32>, vector<1x8x32xf32>, vector<1x8x32xf32> -> vector<4x8x32xf32>
    %23 = vector.extract_strided_slice %12 {offsets = [0, 0], sizes = [8, 32], strides = [1, 1]} : vector<8x128xf32> to vector<8x32xf32>
    %24 = vector.extract_strided_slice %12 {offsets = [0, 32], sizes = [8, 32], strides = [1, 1]} : vector<8x128xf32> to vector<8x32xf32>
    %25 = vector.extract_strided_slice %12 {offsets = [0, 64], sizes = [8, 32], strides = [1, 1]} : vector<8x128xf32> to vector<8x32xf32>
    %26 = vector.extract_strided_slice %12 {offsets = [0, 96], sizes = [8, 32], strides = [1, 1]} : vector<8x128xf32> to vector<8x32xf32>
    %27 = vector.shape_cast %23 : vector<8x32xf32> to vector<1x8x32xf32>
    %28 = vector.shape_cast %24 : vector<8x32xf32> to vector<1x8x32xf32>
    %29 = vector.shape_cast %25 : vector<8x32xf32> to vector<1x8x32xf32>
    %30 = vector.shape_cast %26 : vector<8x32xf32> to vector<1x8x32xf32>
    %31 = tpu.concatenate %27, %28, %29, %30 in 0 : vector<1x8x32xf32>, vector<1x8x32xf32>, vector<1x8x32xf32>, vector<1x8x32xf32> -> vector<4x8x32xf32>
    %32 = vector.extract_strided_slice %13 {offsets = [0, 0], sizes = [8, 32], strides = [1, 1]} : vector<8x128xf32> to vector<8x32xf32>
    %33 = vector.extract_strided_slice %13 {offsets = [0, 32], sizes = [8, 32], strides = [1, 1]} : vector<8x128xf32> to vector<8x32xf32>
    %34 = vector.extract_strided_slice %13 {offsets = [0, 64], sizes = [8, 32], strides = [1, 1]} : vector<8x128xf32> to vector<8x32xf32>
    %35 = vector.extract_strided_slice %13 {offsets = [0, 96], sizes = [8, 32], strides = [1, 1]} : vector<8x128xf32> to vector<8x32xf32>
    %36 = vector.shape_cast %32 : vector<8x32xf32> to vector<1x8x32xf32>
    %37 = vector.shape_cast %33 : vector<8x32xf32> to vector<1x8x32xf32>
    %38 = vector.shape_cast %34 : vector<8x32xf32> to vector<1x8x32xf32>
    %39 = vector.shape_cast %35 : vector<8x32xf32> to vector<1x8x32xf32>
    %40 = tpu.concatenate %36, %37, %38, %39 in 0 : vector<1x8x32xf32>, vector<1x8x32xf32>, vector<1x8x32xf32>, vector<1x8x32xf32> -> vector<4x8x32xf32>
    %41 = arith.truncf %22 : vector<4x8x32xf32> to vector<4x8x32xbf16>
    %42 = arith.truncf %31 : vector<4x8x32xf32> to vector<4x8x32xbf16>
    "tpu.trace_start"() <{level = 10 : i32, message = "hqd,hkd->hqk"}> : () -> ()
    %cst_9 = arith.constant dense<0.000000e+00> : vector<4x8x8xf32>
    %43 = tpu.matmul %41, %42, %cst_9 {dimension_numbers = #tpu.dot_dimension_numbers<[2], [2], [1], [1], [0, 0, 0, 1, 1, 1], [0], [0]>} : vector<4x8x32xbf16>, vector<4x8x32xbf16>, vector<4x8x8xf32> -> vector<4x8x8xf32>
    "tpu.trace_stop"() : () -> ()
    %cst_10 = arith.constant dense<0xFF800000> : vector<4x8xf32>
    %44 = vector.multi_reduction <maximumf>, %43, %cst_10 [2] : vector<4x8x8xf32> to vector<4x8xf32>
    %45 = vector.shape_cast %44 : vector<4x8xf32> to vector<4x8x1xf32>
    %46 = vector.broadcast %45 : vector<4x8x1xf32> to vector<4x8x8xf32>
    %47 = arith.subf %43, %46 : vector<4x8x8xf32>
    %48 = math.exp %47 : vector<4x8x8xf32>
    %cst_11 = arith.constant dense<0.000000e+00> : vector<4x8xf32>
    %49 = vector.multi_reduction <add>, %48, %cst_11 [2] : vector<4x8x8xf32> to vector<4x8xf32>
    %50 = vector.shape_cast %49 : vector<4x8xf32> to vector<4x8x1xf32>
    %51 = tpu.reciprocal %50 {approx = true} : vector<4x8x1xf32> -> vector<4x8x1xf32>
    %52 = vector.broadcast %51 : vector<4x8x1xf32> to vector<4x8x8xf32>
    %53 = arith.mulf %48, %52 : vector<4x8x8xf32>
    %54 = arith.truncf %53 : vector<4x8x8xf32> to vector<4x8x8xbf16>
    %55 = arith.truncf %40 : vector<4x8x32xf32> to vector<4x8x32xbf16>
    "tpu.trace_start"() <{level = 10 : i32, message = "hqk,hkd->hqd"}> : () -> ()
    %cst_12 = arith.constant dense<0.000000e+00> : vector<4x8x32xf32>
    %56 = tpu.matmul %54, %55, %cst_12 {dimension_numbers = #tpu.dot_dimension_numbers<[2], [1], [1], [2], [0, 0, 0, 1, 1, 2], [0], [0]>} : vector<4x8x8xbf16>, vector<4x8x32xbf16>, vector<4x8x32xf32> -> vector<4x8x32xf32>
    "tpu.trace_stop"() : () -> ()
    %57 = vector.extract_strided_slice %56 {offsets = [0, 0, 0], sizes = [1, 8, 32], strides = [1, 1, 1]} : vector<4x8x32xf32> to vector<1x8x32xf32>
    %58 = vector.shape_cast %57 : vector<1x8x32xf32> to vector<8x32xf32>
    %59 = vector.extract_strided_slice %56 {offsets = [1, 0, 0], sizes = [1, 8, 32], strides = [1, 1, 1]} : vector<4x8x32xf32> to vector<1x8x32xf32>
    %60 = vector.shape_cast %59 : vector<1x8x32xf32> to vector<8x32xf32>
    %61 = vector.extract_strided_slice %56 {offsets = [2, 0, 0], sizes = [1, 8, 32], strides = [1, 1, 1]} : vector<4x8x32xf32> to vector<1x8x32xf32>
    %62 = vector.shape_cast %61 : vector<1x8x32xf32> to vector<8x32xf32>
    %63 = vector.extract_strided_slice %56 {offsets = [3, 0, 0], sizes = [1, 8, 32], strides = [1, 1, 1]} : vector<4x8x32xf32> to vector<1x8x32xf32>
    %64 = vector.shape_cast %63 : vector<1x8x32xf32> to vector<8x32xf32>
    %65 = tpu.concatenate %58, %60, %62, %64 in 1 : vector<8x32xf32>, vector<8x32xf32>, vector<8x32xf32>, vector<8x32xf32> -> vector<8x128xf32>
    %c0_13 = arith.constant 0 : index
    %c0_14 = arith.constant 0 : index
    %c0_15 = arith.constant 0 : index
    %66 = vector.load %arg5[%c0_13, %c0_14, %c0_15] : memref<2x128x128xbf16, #tpu.memory_space<vmem>>, vector<1x128x128xbf16>
    %67 = vector.shape_cast %66 : vector<1x128x128xbf16> to vector<128x128xbf16>
    %68 = arith.truncf %65 : vector<8x128xf32> to vector<8x128xbf16>
    %cst_16 = arith.constant dense<0.000000e+00> : vector<8x128xf32>
    %69 = tpu.matmul %68, %67, %cst_16 {dimension_numbers = #tpu.dot_dimension_numbers<[1], [0], [0], [1], [0, 0, 1, 1], [], []>} : vector<8x128xbf16>, vector<128x128xbf16>, vector<8x128xf32> -> vector<8x128xf32>
    %c0_17 = arith.constant 0 : index
    %c0_18 = arith.constant 0 : index
    %c0_19 = arith.constant 0 : index
    %70 = vector.load %arg6[%c0_17, %c0_18, %c0_19] : memref<2x1x128xf32, #tpu.memory_space<vmem>>, vector<1x1x128xf32>
    %71 = vector.shape_cast %70 : vector<1x1x128xf32> to vector<1x128xf32>
    %72 = vector.broadcast %71 : vector<1x128xf32> to vector<8x128xf32>
    %73 = arith.addf %69, %72 : vector<8x128xf32>
    %74 = arith.addf %2, %73 : vector<8x128xf32>
    %c0_20 = arith.constant 0 : index
    %c0_21 = arith.constant 0 : index
    %c0_22 = arith.constant 0 : index
    %75 = vector.load %arg7[%c0_20, %c0_21, %c0_22] : memref<2x1x128xf32, #tpu.memory_space<vmem>>, vector<1x1x128xf32>
    %76 = vector.shape_cast %75 : vector<1x1x128xf32> to vector<1x128xf32>
    %c0_23 = arith.constant 0 : index
    %c0_24 = arith.constant 0 : index
    %c0_25 = arith.constant 0 : index
    %77 = vector.load %arg8[%c0_23, %c0_24, %c0_25] : memref<2x1x128xf32, #tpu.memory_space<vmem>>, vector<1x1x128xf32>
    %78 = vector.shape_cast %77 : vector<1x1x128xf32> to vector<1x128xf32>
    %cst_26 = arith.constant dense<0.000000e+00> : vector<8xf32>
    %79 = vector.multi_reduction <add>, %74, %cst_26 [1] : vector<8x128xf32> to vector<8xf32>
    %80 = vector.shape_cast %79 : vector<8xf32> to vector<8x1xf32>
    %cst_27 = arith.constant 1.280000e+02 : f32
    %81 = vector.broadcast %cst_27 : f32 to vector<8x1xf32>
    %82 = arith.divf %80, %81 : vector<8x1xf32>
    %83 = arith.mulf %74, %74 : vector<8x128xf32>
    %cst_28 = arith.constant dense<0.000000e+00> : vector<8xf32>
    %84 = vector.multi_reduction <add>, %83, %cst_28 [1] : vector<8x128xf32> to vector<8xf32>
    %85 = vector.shape_cast %84 : vector<8xf32> to vector<8x1xf32>
    %cst_29 = arith.constant 1.280000e+02 : f32
    %86 = vector.broadcast %cst_29 : f32 to vector<8x1xf32>
    %87 = arith.divf %85, %86 : vector<8x1xf32>
    %88 = vector.broadcast %82 : vector<8x1xf32> to vector<8x128xf32>
    %89 = arith.subf %74, %88 : vector<8x128xf32>
    %90 = arith.mulf %82, %82 : vector<8x1xf32>
    %91 = arith.subf %87, %90 : vector<8x1xf32>
    %cst_30 = arith.constant 9.99999974E-6 : f32
    %92 = vector.broadcast %cst_30 : f32 to vector<8x1xf32>
    %93 = arith.addf %91, %92 : vector<8x1xf32>
    %94 = math.rsqrt %93 : vector<8x1xf32>
    %95 = vector.broadcast %94 : vector<8x1xf32> to vector<8x128xf32>
    %96 = arith.mulf %89, %95 : vector<8x128xf32>
    %97 = vector.broadcast %76 : vector<1x128xf32> to vector<8x128xf32>
    %98 = arith.mulf %96, %97 : vector<8x128xf32>
    %99 = vector.broadcast %78 : vector<1x128xf32> to vector<8x128xf32>
    %100 = arith.addf %98, %99 : vector<8x128xf32>
    %c0_31 = arith.constant 0 : index
    %c0_32 = arith.constant 0 : index
    %c0_33 = arith.constant 0 : index
    %101 = vector.load %arg9[%c0_31, %c0_32, %c0_33] : memref<2x128x256xbf16, #tpu.memory_space<vmem>>, vector<1x128x256xbf16>
    %102 = vector.shape_cast %101 : vector<1x128x256xbf16> to vector<128x256xbf16>
    %103 = arith.truncf %100 : vector<8x128xf32> to vector<8x128xbf16>
    %cst_34 = arith.constant dense<0.000000e+00> : vector<8x256xf32>
    %104 = tpu.matmul %103, %102, %cst_34 {dimension_numbers = #tpu.dot_dimension_numbers<[1], [0], [0], [1], [0, 0, 1, 1], [], []>} : vector<8x128xbf16>, vector<128x256xbf16>, vector<8x256xf32> -> vector<8x256xf32>
    %c0_35 = arith.constant 0 : index
    %c0_36 = arith.constant 0 : index
    %c0_37 = arith.constant 0 : index
    %105 = vector.load %arg10[%c0_35, %c0_36, %c0_37] : memref<2x1x256xf32, #tpu.memory_space<vmem>>, vector<1x1x256xf32>
    %106 = vector.shape_cast %105 : vector<1x1x256xf32> to vector<1x256xf32>
    %107 = vector.broadcast %106 : vector<1x256xf32> to vector<8x256xf32>
    %108 = arith.addf %104, %107 : vector<8x256xf32>
    %cst_38 = arith.constant 0.000000e+00 : f32
    %109 = vector.broadcast %cst_38 : f32 to vector<8x256xf32>
    %110 = arith.maximumf %108, %109 : vector<8x256xf32>
    %c0_39 = arith.constant 0 : index
    %c0_40 = arith.constant 0 : index
    %c0_41 = arith.constant 0 : index
    %111 = vector.load %arg11[%c0_39, %c0_40, %c0_41] : memref<2x256x128xbf16, #tpu.memory_space<vmem>>, vector<1x256x128xbf16>
    %112 = vector.shape_cast %111 : vector<1x256x128xbf16> to vector<256x128xbf16>
    %113 = arith.truncf %110 : vector<8x256xf32> to vector<8x256xbf16>
    %cst_42 = arith.constant dense<0.000000e+00> : vector<8x128xf32>
    %114 = tpu.matmul %113, %112, %cst_42 {dimension_numbers = #tpu.dot_dimension_numbers<[1], [0], [0], [1], [0, 0, 1, 1], [], []>} : vector<8x256xbf16>, vector<256x128xbf16>, vector<8x128xf32> -> vector<8x128xf32>
    %c0_43 = arith.constant 0 : index
    %c0_44 = arith.constant 0 : index
    %c0_45 = arith.constant 0 : index
    %115 = vector.load %arg12[%c0_43, %c0_44, %c0_45] : memref<2x1x128xf32, #tpu.memory_space<vmem>>, vector<1x1x128xf32>
    %116 = vector.shape_cast %115 : vector<1x1x128xf32> to vector<1x128xf32>
    %117 = vector.broadcast %116 : vector<1x128xf32> to vector<8x128xf32>
    %118 = arith.addf %114, %117 : vector<8x128xf32>
    %119 = arith.addf %100, %118 : vector<8x128xf32>
    %c0_46 = arith.constant 0 : index
    %c0_47 = arith.constant 0 : index
    %c0_48 = arith.constant 0 : index
    %120 = vector.load %arg13[%c0_46, %c0_47, %c0_48] : memref<2x1x128xf32, #tpu.memory_space<vmem>>, vector<1x1x128xf32>
    %121 = vector.shape_cast %120 : vector<1x1x128xf32> to vector<1x128xf32>
    %c0_49 = arith.constant 0 : index
    %c0_50 = arith.constant 0 : index
    %c0_51 = arith.constant 0 : index
    %122 = vector.load %arg14[%c0_49, %c0_50, %c0_51] : memref<2x1x128xf32, #tpu.memory_space<vmem>>, vector<1x1x128xf32>
    %123 = vector.shape_cast %122 : vector<1x1x128xf32> to vector<1x128xf32>
    %cst_52 = arith.constant dense<0.000000e+00> : vector<8xf32>
    %124 = vector.multi_reduction <add>, %119, %cst_52 [1] : vector<8x128xf32> to vector<8xf32>
    %125 = vector.shape_cast %124 : vector<8xf32> to vector<8x1xf32>
    %cst_53 = arith.constant 1.280000e+02 : f32
    %126 = vector.broadcast %cst_53 : f32 to vector<8x1xf32>
    %127 = arith.divf %125, %126 : vector<8x1xf32>
    %128 = arith.mulf %119, %119 : vector<8x128xf32>
    %cst_54 = arith.constant dense<0.000000e+00> : vector<8xf32>
    %129 = vector.multi_reduction <add>, %128, %cst_54 [1] : vector<8x128xf32> to vector<8xf32>
    %130 = vector.shape_cast %129 : vector<8xf32> to vector<8x1xf32>
    %cst_55 = arith.constant 1.280000e+02 : f32
    %131 = vector.broadcast %cst_55 : f32 to vector<8x1xf32>
    %132 = arith.divf %130, %131 : vector<8x1xf32>
    %133 = vector.broadcast %127 : vector<8x1xf32> to vector<8x128xf32>
    %134 = arith.subf %119, %133 : vector<8x128xf32>
    %135 = arith.mulf %127, %127 : vector<8x1xf32>
    %136 = arith.subf %132, %135 : vector<8x1xf32>
    %cst_56 = arith.constant 9.99999974E-6 : f32
    %137 = vector.broadcast %cst_56 : f32 to vector<8x1xf32>
    %138 = arith.addf %136, %137 : vector<8x1xf32>
    %139 = math.rsqrt %138 : vector<8x1xf32>
    %140 = vector.broadcast %139 : vector<8x1xf32> to vector<8x128xf32>
    %141 = arith.mulf %134, %140 : vector<8x128xf32>
    %142 = vector.broadcast %121 : vector<1x128xf32> to vector<8x128xf32>
    %143 = arith.mulf %141, %142 : vector<8x128xf32>
    %144 = vector.broadcast %123 : vector<1x128xf32> to vector<8x128xf32>
    %145 = arith.addf %143, %144 : vector<8x128xf32>
    %c1 = arith.constant 1 : index
    %c0_57 = arith.constant 0 : index
    %c0_58 = arith.constant 0 : index
    %146 = vector.load %arg3[%c1, %c0_57, %c0_58] : memref<2x128x384xbf16, #tpu.memory_space<vmem>>, vector<1x128x384xbf16>
    %147 = vector.shape_cast %146 : vector<1x128x384xbf16> to vector<128x384xbf16>
    %148 = arith.truncf %145 : vector<8x128xf32> to vector<8x128xbf16>
    %cst_59 = arith.constant dense<0.000000e+00> : vector<8x384xf32>
    %149 = tpu.matmul %148, %147, %cst_59 {dimension_numbers = #tpu.dot_dimension_numbers<[1], [0], [0], [1], [0, 0, 1, 1], [], []>} : vector<8x128xbf16>, vector<128x384xbf16>, vector<8x384xf32> -> vector<8x384xf32>
    %c1_60 = arith.constant 1 : index
    %c0_61 = arith.constant 0 : index
    %c0_62 = arith.constant 0 : index
    %150 = vector.load %arg4[%c1_60, %c0_61, %c0_62] : memref<2x1x384xf32, #tpu.memory_space<vmem>>, vector<1x1x384xf32>
    %151 = vector.shape_cast %150 : vector<1x1x384xf32> to vector<1x384xf32>
    %152 = vector.broadcast %151 : vector<1x384xf32> to vector<8x384xf32>
    %153 = arith.addf %149, %152 : vector<8x384xf32>
    %154 = vector.extract_strided_slice %153 {offsets = [0, 0], sizes = [8, 128], strides = [1, 1]} : vector<8x384xf32> to vector<8x128xf32>
    %155 = vector.extract_strided_slice %153 {offsets = [0, 128], sizes = [8, 128], strides = [1, 1]} : vector<8x384xf32> to vector<8x128xf32>
    %156 = vector.extract_strided_slice %153 {offsets = [0, 256], sizes = [8, 128], strides = [1, 1]} : vector<8x384xf32> to vector<8x128xf32>
    %157 = vector.extract_strided_slice %154 {offsets = [0, 0], sizes = [8, 32], strides = [1, 1]} : vector<8x128xf32> to vector<8x32xf32>
    %158 = vector.extract_strided_slice %154 {offsets = [0, 32], sizes = [8, 32], strides = [1, 1]} : vector<8x128xf32> to vector<8x32xf32>
    %159 = vector.extract_strided_slice %154 {offsets = [0, 64], sizes = [8, 32], strides = [1, 1]} : vector<8x128xf32> to vector<8x32xf32>
    %160 = vector.extract_strided_slice %154 {offsets = [0, 96], sizes = [8, 32], strides = [1, 1]} : vector<8x128xf32> to vector<8x32xf32>
    %161 = vector.shape_cast %157 : vector<8x32xf32> to vector<1x8x32xf32>
    %162 = vector.shape_cast %158 : vector<8x32xf32> to vector<1x8x32xf32>
    %163 = vector.shape_cast %159 : vector<8x32xf32> to vector<1x8x32xf32>
    %164 = vector.shape_cast %160 : vector<8x32xf32> to vector<1x8x32xf32>
    %165 = tpu.concatenate %161, %162, %163, %164 in 0 : vector<1x8x32xf32>, vector<1x8x32xf32>, vector<1x8x32xf32>, vector<1x8x32xf32> -> vector<4x8x32xf32>
    %166 = vector.extract_strided_slice %155 {offsets = [0, 0], sizes = [8, 32], strides = [1, 1]} : vector<8x128xf32> to vector<8x32xf32>
    %167 = vector.extract_strided_slice %155 {offsets = [0, 32], sizes = [8, 32], strides = [1, 1]} : vector<8x128xf32> to vector<8x32xf32>
    %168 = vector.extract_strided_slice %155 {offsets = [0, 64], sizes = [8, 32], strides = [1, 1]} : vector<8x128xf32> to vector<8x32xf32>
    %169 = vector.extract_strided_slice %155 {offsets = [0, 96], sizes = [8, 32], strides = [1, 1]} : vector<8x128xf32> to vector<8x32xf32>
    %170 = vector.shape_cast %166 : vector<8x32xf32> to vector<1x8x32xf32>
    %171 = vector.shape_cast %167 : vector<8x32xf32> to vector<1x8x32xf32>
    %172 = vector.shape_cast %168 : vector<8x32xf32> to vector<1x8x32xf32>
    %173 = vector.shape_cast %169 : vector<8x32xf32> to vector<1x8x32xf32>
    %174 = tpu.concatenate %170, %171, %172, %173 in 0 : vector<1x8x32xf32>, vector<1x8x32xf32>, vector<1x8x32xf32>, vector<1x8x32xf32> -> vector<4x8x32xf32>
    %175 = vector.extract_strided_slice %156 {offsets = [0, 0], sizes = [8, 32], strides = [1, 1]} : vector<8x128xf32> to vector<8x32xf32>
    %176 = vector.extract_strided_slice %156 {offsets = [0, 32], sizes = [8, 32], strides = [1, 1]} : vector<8x128xf32> to vector<8x32xf32>
    %177 = vector.extract_strided_slice %156 {offsets = [0, 64], sizes = [8, 32], strides = [1, 1]} : vector<8x128xf32> to vector<8x32xf32>
    %178 = vector.extract_strided_slice %156 {offsets = [0, 96], sizes = [8, 32], strides = [1, 1]} : vector<8x128xf32> to vector<8x32xf32>
    %179 = vector.shape_cast %175 : vector<8x32xf32> to vector<1x8x32xf32>
    %180 = vector.shape_cast %176 : vector<8x32xf32> to vector<1x8x32xf32>
    %181 = vector.shape_cast %177 : vector<8x32xf32> to vector<1x8x32xf32>
    %182 = vector.shape_cast %178 : vector<8x32xf32> to vector<1x8x32xf32>
    %183 = tpu.concatenate %179, %180, %181, %182 in 0 : vector<1x8x32xf32>, vector<1x8x32xf32>, vector<1x8x32xf32>, vector<1x8x32xf32> -> vector<4x8x32xf32>
    %184 = arith.truncf %165 : vector<4x8x32xf32> to vector<4x8x32xbf16>
    %185 = arith.truncf %174 : vector<4x8x32xf32> to vector<4x8x32xbf16>
    "tpu.trace_start"() <{level = 10 : i32, message = "hqd,hkd->hqk"}> : () -> ()
    %cst_63 = arith.constant dense<0.000000e+00> : vector<4x8x8xf32>
    %186 = tpu.matmul %184, %185, %cst_63 {dimension_numbers = #tpu.dot_dimension_numbers<[2], [2], [1], [1], [0, 0, 0, 1, 1, 1], [0], [0]>} : vector<4x8x32xbf16>, vector<4x8x32xbf16>, vector<4x8x8xf32> -> vector<4x8x8xf32>
    "tpu.trace_stop"() : () -> ()
    %cst_64 = arith.constant dense<0xFF800000> : vector<4x8xf32>
    %187 = vector.multi_reduction <maximumf>, %186, %cst_64 [2] : vector<4x8x8xf32> to vector<4x8xf32>
    %188 = vector.shape_cast %187 : vector<4x8xf32> to vector<4x8x1xf32>
    %189 = vector.broadcast %188 : vector<4x8x1xf32> to vector<4x8x8xf32>
    %190 = arith.subf %186, %189 : vector<4x8x8xf32>
    %191 = math.exp %190 : vector<4x8x8xf32>
    %cst_65 = arith.constant dense<0.000000e+00> : vector<4x8xf32>
    %192 = vector.multi_reduction <add>, %191, %cst_65 [2] : vector<4x8x8xf32> to vector<4x8xf32>
    %193 = vector.shape_cast %192 : vector<4x8xf32> to vector<4x8x1xf32>
    %194 = tpu.reciprocal %193 {approx = true} : vector<4x8x1xf32> -> vector<4x8x1xf32>
    %195 = vector.broadcast %194 : vector<4x8x1xf32> to vector<4x8x8xf32>
    %196 = arith.mulf %191, %195 : vector<4x8x8xf32>
    %197 = arith.truncf %196 : vector<4x8x8xf32> to vector<4x8x8xbf16>
    %198 = arith.truncf %183 : vector<4x8x32xf32> to vector<4x8x32xbf16>
    "tpu.trace_start"() <{level = 10 : i32, message = "hqk,hkd->hqd"}> : () -> ()
    %cst_66 = arith.constant dense<0.000000e+00> : vector<4x8x32xf32>
    %199 = tpu.matmul %197, %198, %cst_66 {dimension_numbers = #tpu.dot_dimension_numbers<[2], [1], [1], [2], [0, 0, 0, 1, 1, 2], [0], [0]>} : vector<4x8x8xbf16>, vector<4x8x32xbf16>, vector<4x8x32xf32> -> vector<4x8x32xf32>
    "tpu.trace_stop"() : () -> ()
    %200 = vector.extract_strided_slice %199 {offsets = [0, 0, 0], sizes = [1, 8, 32], strides = [1, 1, 1]} : vector<4x8x32xf32> to vector<1x8x32xf32>
    %201 = vector.shape_cast %200 : vector<1x8x32xf32> to vector<8x32xf32>
    %202 = vector.extract_strided_slice %199 {offsets = [1, 0, 0], sizes = [1, 8, 32], strides = [1, 1, 1]} : vector<4x8x32xf32> to vector<1x8x32xf32>
    %203 = vector.shape_cast %202 : vector<1x8x32xf32> to vector<8x32xf32>
    %204 = vector.extract_strided_slice %199 {offsets = [2, 0, 0], sizes = [1, 8, 32], strides = [1, 1, 1]} : vector<4x8x32xf32> to vector<1x8x32xf32>
    %205 = vector.shape_cast %204 : vector<1x8x32xf32> to vector<8x32xf32>
    %206 = vector.extract_strided_slice %199 {offsets = [3, 0, 0], sizes = [1, 8, 32], strides = [1, 1, 1]} : vector<4x8x32xf32> to vector<1x8x32xf32>
    %207 = vector.shape_cast %206 : vector<1x8x32xf32> to vector<8x32xf32>
    %208 = tpu.concatenate %201, %203, %205, %207 in 1 : vector<8x32xf32>, vector<8x32xf32>, vector<8x32xf32>, vector<8x32xf32> -> vector<8x128xf32>
    %c1_67 = arith.constant 1 : index
    %c0_68 = arith.constant 0 : index
    %c0_69 = arith.constant 0 : index
    %209 = vector.load %arg5[%c1_67, %c0_68, %c0_69] : memref<2x128x128xbf16, #tpu.memory_space<vmem>>, vector<1x128x128xbf16>
    %210 = vector.shape_cast %209 : vector<1x128x128xbf16> to vector<128x128xbf16>
    %211 = arith.truncf %208 : vector<8x128xf32> to vector<8x128xbf16>
    %cst_70 = arith.constant dense<0.000000e+00> : vector<8x128xf32>
    %212 = tpu.matmul %211, %210, %cst_70 {dimension_numbers = #tpu.dot_dimension_numbers<[1], [0], [0], [1], [0, 0, 1, 1], [], []>} : vector<8x128xbf16>, vector<128x128xbf16>, vector<8x128xf32> -> vector<8x128xf32>
    %c1_71 = arith.constant 1 : index
    %c0_72 = arith.constant 0 : index
    %c0_73 = arith.constant 0 : index
    %213 = vector.load %arg6[%c1_71, %c0_72, %c0_73] : memref<2x1x128xf32, #tpu.memory_space<vmem>>, vector<1x1x128xf32>
    %214 = vector.shape_cast %213 : vector<1x1x128xf32> to vector<1x128xf32>
    %215 = vector.broadcast %214 : vector<1x128xf32> to vector<8x128xf32>
    %216 = arith.addf %212, %215 : vector<8x128xf32>
    %217 = arith.addf %145, %216 : vector<8x128xf32>
    %c1_74 = arith.constant 1 : index
    %c0_75 = arith.constant 0 : index
    %c0_76 = arith.constant 0 : index
    %218 = vector.load %arg7[%c1_74, %c0_75, %c0_76] : memref<2x1x128xf32, #tpu.memory_space<vmem>>, vector<1x1x128xf32>
    %219 = vector.shape_cast %218 : vector<1x1x128xf32> to vector<1x128xf32>
    %c1_77 = arith.constant 1 : index
    %c0_78 = arith.constant 0 : index
    %c0_79 = arith.constant 0 : index
    %220 = vector.load %arg8[%c1_77, %c0_78, %c0_79] : memref<2x1x128xf32, #tpu.memory_space<vmem>>, vector<1x1x128xf32>
    %221 = vector.shape_cast %220 : vector<1x1x128xf32> to vector<1x128xf32>
    %cst_80 = arith.constant dense<0.000000e+00> : vector<8xf32>
    %222 = vector.multi_reduction <add>, %217, %cst_80 [1] : vector<8x128xf32> to vector<8xf32>
    %223 = vector.shape_cast %222 : vector<8xf32> to vector<8x1xf32>
    %cst_81 = arith.constant 1.280000e+02 : f32
    %224 = vector.broadcast %cst_81 : f32 to vector<8x1xf32>
    %225 = arith.divf %223, %224 : vector<8x1xf32>
    %226 = arith.mulf %217, %217 : vector<8x128xf32>
    %cst_82 = arith.constant dense<0.000000e+00> : vector<8xf32>
    %227 = vector.multi_reduction <add>, %226, %cst_82 [1] : vector<8x128xf32> to vector<8xf32>
    %228 = vector.shape_cast %227 : vector<8xf32> to vector<8x1xf32>
    %cst_83 = arith.constant 1.280000e+02 : f32
    %229 = vector.broadcast %cst_83 : f32 to vector<8x1xf32>
    %230 = arith.divf %228, %229 : vector<8x1xf32>
    %231 = vector.broadcast %225 : vector<8x1xf32> to vector<8x128xf32>
    %232 = arith.subf %217, %231 : vector<8x128xf32>
    %233 = arith.mulf %225, %225 : vector<8x1xf32>
    %234 = arith.subf %230, %233 : vector<8x1xf32>
    %cst_84 = arith.constant 9.99999974E-6 : f32
    %235 = vector.broadcast %cst_84 : f32 to vector<8x1xf32>
    %236 = arith.addf %234, %235 : vector<8x1xf32>
    %237 = math.rsqrt %236 : vector<8x1xf32>
    %238 = vector.broadcast %237 : vector<8x1xf32> to vector<8x128xf32>
    %239 = arith.mulf %232, %238 : vector<8x128xf32>
    %240 = vector.broadcast %219 : vector<1x128xf32> to vector<8x128xf32>
    %241 = arith.mulf %239, %240 : vector<8x128xf32>
    %242 = vector.broadcast %221 : vector<1x128xf32> to vector<8x128xf32>
    %243 = arith.addf %241, %242 : vector<8x128xf32>
    %c1_85 = arith.constant 1 : index
    %c0_86 = arith.constant 0 : index
    %c0_87 = arith.constant 0 : index
    %244 = vector.load %arg9[%c1_85, %c0_86, %c0_87] : memref<2x128x256xbf16, #tpu.memory_space<vmem>>, vector<1x128x256xbf16>
    %245 = vector.shape_cast %244 : vector<1x128x256xbf16> to vector<128x256xbf16>
    %246 = arith.truncf %243 : vector<8x128xf32> to vector<8x128xbf16>
    %cst_88 = arith.constant dense<0.000000e+00> : vector<8x256xf32>
    %247 = tpu.matmul %246, %245, %cst_88 {dimension_numbers = #tpu.dot_dimension_numbers<[1], [0], [0], [1], [0, 0, 1, 1], [], []>} : vector<8x128xbf16>, vector<128x256xbf16>, vector<8x256xf32> -> vector<8x256xf32>
    %c1_89 = arith.constant 1 : index
    %c0_90 = arith.constant 0 : index
    %c0_91 = arith.constant 0 : index
    %248 = vector.load %arg10[%c1_89, %c0_90, %c0_91] : memref<2x1x256xf32, #tpu.memory_space<vmem>>, vector<1x1x256xf32>
    %249 = vector.shape_cast %248 : vector<1x1x256xf32> to vector<1x256xf32>
    %250 = vector.broadcast %249 : vector<1x256xf32> to vector<8x256xf32>
    %251 = arith.addf %247, %250 : vector<8x256xf32>
    %cst_92 = arith.constant 0.000000e+00 : f32
    %252 = vector.broadcast %cst_92 : f32 to vector<8x256xf32>
    %253 = arith.maximumf %251, %252 : vector<8x256xf32>
    %c1_93 = arith.constant 1 : index
    %c0_94 = arith.constant 0 : index
    %c0_95 = arith.constant 0 : index
    %254 = vector.load %arg11[%c1_93, %c0_94, %c0_95] : memref<2x256x128xbf16, #tpu.memory_space<vmem>>, vector<1x256x128xbf16>
    %255 = vector.shape_cast %254 : vector<1x256x128xbf16> to vector<256x128xbf16>
    %256 = arith.truncf %253 : vector<8x256xf32> to vector<8x256xbf16>
    %cst_96 = arith.constant dense<0.000000e+00> : vector<8x128xf32>
    %257 = tpu.matmul %256, %255, %cst_96 {dimension_numbers = #tpu.dot_dimension_numbers<[1], [0], [0], [1], [0, 0, 1, 1], [], []>} : vector<8x256xbf16>, vector<256x128xbf16>, vector<8x128xf32> -> vector<8x128xf32>
    %c1_97 = arith.constant 1 : index
    %c0_98 = arith.constant 0 : index
    %c0_99 = arith.constant 0 : index
    %258 = vector.load %arg12[%c1_97, %c0_98, %c0_99] : memref<2x1x128xf32, #tpu.memory_space<vmem>>, vector<1x1x128xf32>
    %259 = vector.shape_cast %258 : vector<1x1x128xf32> to vector<1x128xf32>
    %260 = vector.broadcast %259 : vector<1x128xf32> to vector<8x128xf32>
    %261 = arith.addf %257, %260 : vector<8x128xf32>
    %262 = arith.addf %243, %261 : vector<8x128xf32>
    %c1_100 = arith.constant 1 : index
    %c0_101 = arith.constant 0 : index
    %c0_102 = arith.constant 0 : index
    %263 = vector.load %arg13[%c1_100, %c0_101, %c0_102] : memref<2x1x128xf32, #tpu.memory_space<vmem>>, vector<1x1x128xf32>
    %264 = vector.shape_cast %263 : vector<1x1x128xf32> to vector<1x128xf32>
    %c1_103 = arith.constant 1 : index
    %c0_104 = arith.constant 0 : index
    %c0_105 = arith.constant 0 : index
    %265 = vector.load %arg14[%c1_103, %c0_104, %c0_105] : memref<2x1x128xf32, #tpu.memory_space<vmem>>, vector<1x1x128xf32>
    %266 = vector.shape_cast %265 : vector<1x1x128xf32> to vector<1x128xf32>
    %cst_106 = arith.constant dense<0.000000e+00> : vector<8xf32>
    %267 = vector.multi_reduction <add>, %262, %cst_106 [1] : vector<8x128xf32> to vector<8xf32>
    %268 = vector.shape_cast %267 : vector<8xf32> to vector<8x1xf32>
    %cst_107 = arith.constant 1.280000e+02 : f32
    %269 = vector.broadcast %cst_107 : f32 to vector<8x1xf32>
    %270 = arith.divf %268, %269 : vector<8x1xf32>
    %271 = arith.mulf %262, %262 : vector<8x128xf32>
    %cst_108 = arith.constant dense<0.000000e+00> : vector<8xf32>
    %272 = vector.multi_reduction <add>, %271, %cst_108 [1] : vector<8x128xf32> to vector<8xf32>
    %273 = vector.shape_cast %272 : vector<8xf32> to vector<8x1xf32>
    %cst_109 = arith.constant 1.280000e+02 : f32
    %274 = vector.broadcast %cst_109 : f32 to vector<8x1xf32>
    %275 = arith.divf %273, %274 : vector<8x1xf32>
    %276 = vector.broadcast %270 : vector<8x1xf32> to vector<8x128xf32>
    %277 = arith.subf %262, %276 : vector<8x128xf32>
    %278 = arith.mulf %270, %270 : vector<8x1xf32>
    %279 = arith.subf %275, %278 : vector<8x1xf32>
    %cst_110 = arith.constant 9.99999974E-6 : f32
    %280 = vector.broadcast %cst_110 : f32 to vector<8x1xf32>
    %281 = arith.addf %279, %280 : vector<8x1xf32>
    %282 = math.rsqrt %281 : vector<8x1xf32>
    %283 = vector.broadcast %282 : vector<8x1xf32> to vector<8x128xf32>
    %284 = arith.mulf %277, %283 : vector<8x128xf32>
    %285 = vector.broadcast %264 : vector<1x128xf32> to vector<8x128xf32>
    %286 = arith.mulf %284, %285 : vector<8x128xf32>
    %287 = vector.broadcast %266 : vector<1x128xf32> to vector<8x128xf32>
    %288 = arith.addf %286, %287 : vector<8x128xf32>
    %c0_111 = arith.constant 0 : index
    %c0_112 = arith.constant 0 : index
    %289 = vector.load %arg15[%c0_111, %c0_112] : memref<1x128xf32, #tpu.memory_space<vmem>>, vector<1x128xf32>
    %c0_113 = arith.constant 0 : index
    %c0_114 = arith.constant 0 : index
    %290 = vector.load %arg16[%c0_113, %c0_114] : memref<1x128xf32, #tpu.memory_space<vmem>>, vector<1x128xf32>
    %cst_115 = arith.constant dense<0.000000e+00> : vector<8xf32>
    %291 = vector.multi_reduction <add>, %288, %cst_115 [1] : vector<8x128xf32> to vector<8xf32>
    %292 = vector.shape_cast %291 : vector<8xf32> to vector<8x1xf32>
    %cst_116 = arith.constant 1.280000e+02 : f32
    %293 = vector.broadcast %cst_116 : f32 to vector<8x1xf32>
    %294 = arith.divf %292, %293 : vector<8x1xf32>
    %295 = arith.mulf %288, %288 : vector<8x128xf32>
    %cst_117 = arith.constant dense<0.000000e+00> : vector<8xf32>
    %296 = vector.multi_reduction <add>, %295, %cst_117 [1] : vector<8x128xf32> to vector<8xf32>
    %297 = vector.shape_cast %296 : vector<8xf32> to vector<8x1xf32>
    %cst_118 = arith.constant 1.280000e+02 : f32
    %298 = vector.broadcast %cst_118 : f32 to vector<8x1xf32>
    %299 = arith.divf %297, %298 : vector<8x1xf32>
    %300 = vector.broadcast %294 : vector<8x1xf32> to vector<8x128xf32>
    %301 = arith.subf %288, %300 : vector<8x128xf32>
    %302 = arith.mulf %294, %294 : vector<8x1xf32>
    %303 = arith.subf %299, %302 : vector<8x1xf32>
    %cst_119 = arith.constant 9.99999974E-6 : f32
    %304 = vector.broadcast %cst_119 : f32 to vector<8x1xf32>
    %305 = arith.addf %303, %304 : vector<8x1xf32>
    %306 = math.rsqrt %305 : vector<8x1xf32>
    %307 = vector.broadcast %306 : vector<8x1xf32> to vector<8x128xf32>
    %308 = arith.mulf %301, %307 : vector<8x128xf32>
    %309 = vector.broadcast %289 : vector<1x128xf32> to vector<8x128xf32>
    %310 = arith.mulf %308, %309 : vector<8x128xf32>
    %311 = vector.broadcast %290 : vector<1x128xf32> to vector<8x128xf32>
    %312 = arith.addf %310, %311 : vector<8x128xf32>
    %cst_120 = arith.constant dense<0.000000e+00> : vector<128xf32>
    %313 = vector.multi_reduction <add>, %312, %cst_120 [0] : vector<8x128xf32> to vector<128xf32>
    %314 = vector.shape_cast %313 : vector<128xf32> to vector<1x128xf32>
    %c0_121 = arith.constant 0 : index
    %c0_122 = arith.constant 0 : index
    %315 = vector.load %arg17[%c0_121, %c0_122] : memref<128x64xbf16, #tpu.memory_space<vmem>>, vector<128x64xbf16>
    %316 = arith.truncf %314 : vector<1x128xf32> to vector<1x128xbf16>
    %cst_123 = arith.constant dense<0.000000e+00> : vector<1x64xf32>
    %317 = tpu.matmul %316, %315, %cst_123 {dimension_numbers = #tpu.dot_dimension_numbers<[1], [0], [0], [1], [0, 0, 1, 1], [], []>} : vector<1x128xbf16>, vector<128x64xbf16>, vector<1x64xf32> -> vector<1x64xf32>
    %c0_124 = arith.constant 0 : index
    %c0_125 = arith.constant 0 : index
    %318 = vector.load %arg18[%c0_124, %c0_125] : memref<1x64xf32, #tpu.memory_space<vmem>>, vector<1x64xf32>
    %319 = arith.addf %317, %318 : vector<1x64xf32>
    %c0_126 = arith.constant 0 : index
    %c0_127 = arith.constant 0 : index
    %320 = vector.load %arg19[%c0_126, %c0_127] : memref<64x4xbf16, #tpu.memory_space<vmem>>, vector<64x4xbf16>
    %321 = arith.truncf %319 : vector<1x64xf32> to vector<1x64xbf16>
    %cst_128 = arith.constant dense<0.000000e+00> : vector<1x4xf32>
    %322 = tpu.matmul %321, %320, %cst_128 {dimension_numbers = #tpu.dot_dimension_numbers<[1], [0], [0], [1], [0, 0, 1, 1], [], []>} : vector<1x64xbf16>, vector<64x4xbf16>, vector<1x4xf32> -> vector<1x4xf32>
    %c0_129 = arith.constant 0 : index
    %c0_130 = arith.constant 0 : index
    %323 = vector.load %arg20[%c0_129, %c0_130] : memref<1x4xf32, #tpu.memory_space<vmem>>, vector<1x4xf32>
    %324 = arith.addf %322, %323 : vector<1x4xf32>
    %c0_131 = arith.constant 0 : index
    %c0_132 = arith.constant 0 : index
    %c0_133 = arith.constant 0 : index
    %325 = vector.load %arg21[%c0_131, %c0_132, %c0_133] : memref<1x1x4xf32, #tpu.memory_space<vmem>>, vector<1x1x4xf32>
    %326 = vector.shape_cast %325 : vector<1x1x4xf32> to vector<1x4xf32>
    %327 = vector.shape_cast %324 : vector<1x4xf32> to vector<1x1x4xf32>
    tpu.vector_store %arg21[%c0_131, %c0_132, %c0_133], %327 {strides = array<i32>} : memref<1x1x4xf32, #tpu.memory_space<vmem>>, vector<1x1x4xf32>,
    return
  }
  func.func @transform_0(%arg0: i32) -> (i32, i32) {
    %c0_i32 = arith.constant 0 : i32
    %c0_i32_0 = arith.constant 0 : i32
    return %c0_i32, %arg0 : i32, i32
  }
  func.func @transform_1(%arg0: i32) -> (i32, i32) {
    %c0_i32 = arith.constant 0 : i32
    %c0_i32_0 = arith.constant 0 : i32
    %c0_i32_1 = arith.constant 0 : i32
    return %c0_i32, %c0_i32_0 : i32, i32
  }
  func.func @transform_2(%arg0: i32) -> (i32, i32, i32) {
    %c0_i32 = arith.constant 0 : i32
    %c0_i32_0 = arith.constant 0 : i32
    %c0_i32_1 = arith.constant 0 : i32
    %c0_i32_2 = arith.constant 0 : i32
    return %c0_i32, %c0_i32_0, %c0_i32_1 : i32, i32, i32
  }
  func.func @transform_3(%arg0: i32) -> (i32, i32, i32) {
    %c0_i32 = arith.constant 0 : i32
    %c0_i32_0 = arith.constant 0 : i32
    %c0_i32_1 = arith.constant 0 : i32
    %c0_i32_2 = arith.constant 0 : i32
    return %c0_i32, %c0_i32_0, %c0_i32_1 : i32, i32, i32
  }
  func.func @transform_4(%arg0: i32) -> (i32, i32, i32) {
    %c0_i32 = arith.constant 0 : i32
    %c0_i32_0 = arith.constant 0 : i32
    %c0_i32_1 = arith.constant 0 : i32
    %c0_i32_2 = arith.constant 0 : i32
    return %c0_i32, %c0_i32_0, %c0_i32_1 : i32, i32, i32
  }
  func.func @transform_5(%arg0: i32) -> (i32, i32, i32) {
    %c0_i32 = arith.constant 0 : i32
    %c0_i32_0 = arith.constant 0 : i32
    %c0_i32_1 = arith.constant 0 : i32
    %c0_i32_2 = arith.constant 0 : i32
    return %c0_i32, %c0_i32_0, %c0_i32_1 : i32, i32, i32
  }
  func.func @transform_6(%arg0: i32) -> (i32, i32, i32) {
    %c0_i32 = arith.constant 0 : i32
    %c0_i32_0 = arith.constant 0 : i32
    %c0_i32_1 = arith.constant 0 : i32
    %c0_i32_2 = arith.constant 0 : i32
    return %c0_i32, %c0_i32_0, %c0_i32_1 : i32, i32, i32
  }
  func.func @transform_7(%arg0: i32) -> (i32, i32, i32) {
    %c0_i32 = arith.constant 0 : i32
    %c0_i32_0 = arith.constant 0 : i32
    %c0_i32_1 = arith.constant 0 : i32
    %c0_i32_2 = arith.constant 0 : i32
    return %c0_i32, %c0_i32_0, %c0_i32_1 : i32, i32, i32
  }
  func.func @transform_8(%arg0: i32) -> (i32, i32, i32) {
    %c0_i32 = arith.constant 0 : i32
    %c0_i32_0 = arith.constant 0 : i32
    %c0_i32_1 = arith.constant 0 : i32
    %c0_i32_2 = arith.constant 0 : i32
    return %c0_i32, %c0_i32_0, %c0_i32_1 : i32, i32, i32
  }
  func.func @transform_9(%arg0: i32) -> (i32, i32, i32) {
    %c0_i32 = arith.constant 0 : i32
    %c0_i32_0 = arith.constant 0 : i32
    %c0_i32_1 = arith.constant 0 : i32
    %c0_i32_2 = arith.constant 0 : i32
    return %c0_i32, %c0_i32_0, %c0_i32_1 : i32, i32, i32
  }
  func.func @transform_10(%arg0: i32) -> (i32, i32, i32) {
    %c0_i32 = arith.constant 0 : i32
    %c0_i32_0 = arith.constant 0 : i32
    %c0_i32_1 = arith.constant 0 : i32
    %c0_i32_2 = arith.constant 0 : i32
    return %c0_i32, %c0_i32_0, %c0_i32_1 : i32, i32, i32
  }
  func.func @transform_11(%arg0: i32) -> (i32, i32, i32) {
    %c0_i32 = arith.constant 0 : i32
    %c0_i32_0 = arith.constant 0 : i32
    %c0_i32_1 = arith.constant 0 : i32
    %c0_i32_2 = arith.constant 0 : i32
    return %c0_i32, %c0_i32_0, %c0_i32_1 : i32, i32, i32
  }
  func.func @transform_12(%arg0: i32) -> (i32, i32, i32) {
    %c0_i32 = arith.constant 0 : i32
    %c0_i32_0 = arith.constant 0 : i32
    %c0_i32_1 = arith.constant 0 : i32
    %c0_i32_2 = arith.constant 0 : i32
    return %c0_i32, %c0_i32_0, %c0_i32_1 : i32, i32, i32
  }
  func.func @transform_13(%arg0: i32) -> (i32, i32, i32) {
    %c0_i32 = arith.constant 0 : i32
    %c0_i32_0 = arith.constant 0 : i32
    %c0_i32_1 = arith.constant 0 : i32
    %c0_i32_2 = arith.constant 0 : i32
    return %c0_i32, %c0_i32_0, %c0_i32_1 : i32, i32, i32
  }
  func.func @transform_14(%arg0: i32) -> (i32, i32) {
    %c0_i32 = arith.constant 0 : i32
    %c0_i32_0 = arith.constant 0 : i32
    %c0_i32_1 = arith.constant 0 : i32
    return %c0_i32, %c0_i32_0 : i32, i32
  }
  func.func @transform_15(%arg0: i32) -> (i32, i32) {
    %c0_i32 = arith.constant 0 : i32
    %c0_i32_0 = arith.constant 0 : i32
    %c0_i32_1 = arith.constant 0 : i32
    return %c0_i32, %c0_i32_0 : i32, i32
  }
  func.func @transform_16(%arg0: i32) -> (i32, i32) {
    %c0_i32 = arith.constant 0 : i32
    %c0_i32_0 = arith.constant 0 : i32
    %c0_i32_1 = arith.constant 0 : i32
    return %c0_i32, %c0_i32_0 : i32, i32
  }
  func.func @transform_17(%arg0: i32) -> (i32, i32) {
    %c0_i32 = arith.constant 0 : i32
    %c0_i32_0 = arith.constant 0 : i32
    %c0_i32_1 = arith.constant 0 : i32
    return %c0_i32, %c0_i32_0 : i32, i32
  }
  func.func @transform_18(%arg0: i32) -> (i32, i32) {
    %c0_i32 = arith.constant 0 : i32
    %c0_i32_0 = arith.constant 0 : i32
    %c0_i32_1 = arith.constant 0 : i32
    return %c0_i32, %c0_i32_0 : i32, i32
  }
  func.func @transform_19(%arg0: i32) -> (i32, i32) {
    %c0_i32 = arith.constant 0 : i32
    %c0_i32_0 = arith.constant 0 : i32
    %c0_i32_1 = arith.constant 0 : i32
    return %c0_i32, %c0_i32_0 : i32, i32
  }
  func.func @transform_20(%arg0: i32) -> (i32, i32, i32) {
    %c0_i32 = arith.constant 0 : i32
    %c0_i32_0 = arith.constant 0 : i32
    %c0_i32_1 = arith.constant 0 : i32
    return %arg0, %c0_i32, %c0_i32_0 : i32, i32, i32
  }
}

</mosaic_0001>

<bundles_post_ra>
// kernel: forward.1
= control target key start
LH: loop header
LB: loop body
LE: loop exit
PB: predicated region body
PF: predicated region fallthrough
CT: control target
= control target key end

     0   :  { %s5178_s0 = inlined_call_operand.vmem [shape: f32[8,256], index: 0, kind: input, shape index: {}]   ;;  %s5179_s1 = inlined_call_operand.vmem [shape: f32[8,128], index: 1, kind: input, shape index: {}]   ;;  %s5180_s2 = inlined_call_operand.hbm [shape: bf16[2,128,384], index: 2, kind: input, shape index: {}]   ;;  %s5181_s3 = inlined_call_operand.vmem [shape: f32[2,1,384], index: 3, kind: input, shape index: {}]   ;;  %s5182_s4 = inlined_call_operand.vmem [shape: bf16[2,128,128], index: 4, kind: input, shape index: {}]   ;;  %s5183_s5 = inlined_call_operand.vmem [shape: f32[2,1,128], index: 5, kind: input, shape index: {}]   ;;  %s5184_s6 = inlined_call_operand.vmem [shape: f32[2,1,128], index: 6, kind: input, shape index: {}]   ;;  %s5185_s7 = inlined_call_operand.vmem [shape: f32[2,1,128], index: 7, kind: input, shape index: {}]   ;;  %s5186_s8 = inlined_call_operand.hbm [shape: bf16[2,128,256], index: 8, kind: input, shape index: {}]   ;;  %s5187_s9 = inlined_call_operand.vmem [shape: f32[2,1,256], index: 9, kind: input, shape index: {}]   ;;  %s5188_s10 = inlined_call_operand.hbm [shape: bf16[2,256,128], index: 10, kind: input, shape index: {}]   ;;  %s5189_s11 = inlined_call_operand.vmem [shape: f32[2,1,128], index: 11, kind: input, shape index: {}]   ;;  %s5190_s12 = inlined_call_operand.vmem [shape: f32[2,1,128], index: 12, kind: input, shape index: {}]   ;;  %s5191_s13 = inlined_call_operand.vmem [shape: f32[2,1,128], index: 13, kind: input, shape index: {}]   ;;  %s5192_s14 = inlined_call_operand.vmem [shape: f32[1,128], index: 14, kind: input, shape index: {}]   ;;  %s5193_s15 = inlined_call_operand.vmem [shape: f32[1,128], index: 15, kind: input, shape index: {}]   ;;  %s5194_s16 = inlined_call_operand.vmem [shape: bf16[128,64], index: 16, kind: input, shape index: {}]   ;;  %s5195_s17 = inlined_call_operand.vmem [shape: f32[1,64], index: 17, kind: input, shape index: {}]   ;;  %s5196_s18 = inlined_call_operand.vmem [shape: bf16[64,4], index: 18, kind: input, shape index: {}]   ;;  %s5197_s19 = inlined_call_operand.vmem [shape: f32[1,4], index: 19, kind: input, shape index: {}]   ;;  %s5198_s20 = inlined_call_operand.hbm [shape: f32[2,1,4], index: 20, kind: output, shape index: {}]  }
   0x1   :  { %5215 = sst [smem:[#allocation20_spill]] %s5178_s0 }
   0x2   :  { %5216 = sst [smem:[#allocation21_spill]] %s5179_s1 }
   0x3   :  { %5217 = sst [smem:[#allocation22_spill]] %s5180_s2 }
   0x4   :  { %5218 = sst [smem:[#allocation23_spill]] %s5181_s3 }
   0x5   :  { %5219 = sst [smem:[#allocation24_spill]] %s5182_s4 }
   0x6   :  { %5220 = sst [smem:[#allocation25_spill]] %s5186_s8 }
   0x7   :  { %5221 = sst [smem:[#allocation26_spill]] %s5195_s17 }
   0x8   :  { %5222 = sst [smem:[#allocation27_spill]] %s5197_s19 }
   0x9   :  { %5223 = sst [smem:[#allocation28_spill]] %s5198_s20 }
   0xa   :  { %25 = vsyncpa [#allocation3], 0 }
   0xb   :  { %26 = vsyncpa [#allocation6], 0 }
   0xc   :  { %27 = vsyncpa [#allocation4], 0 }
   0xd   :  { %29 = vsyncpa [#allocation4 + $0x1], 0  ;;  %s4591_s1 = smov 0   ;;  %s4593_s22 = smov 0  }
   0xe   :  { %s4595_s23 = smov 0   ;;  %s4597_s24 = smov 0  }
   0xf LB: > { %5224 = sst [smem:[#allocation12_spill]] %s4456_s1  ;;  %s4612_s2 = sadd.s32 4294967295, %s4468_s24   ;;  %s4468_s24 = sphi %s4597_s24, %s5258_s24   ;;  %s4464_s23 = sphi %s4595_s23, %s5261_s23   ;;  %s4460_s22 = sphi %s4593_s22, %s5260_s22   ;;  %s4456_s1 = sphi %s4591_s1, %s5259_s1  }
  0x10   : > { %5225 = sst [smem:[#allocation13_spill]] %s4460_s22  ;;  %s3475_s25 = sadd.s32 4294967294, %s4468_s24  }
  0x11   : > { %5226 = sst [smem:[#allocation14_spill]] %s4464_s23  ;;  %s4616_s3 = sadd.s32 1, %s4468_s24  }
  0x12   : > { %5227 = sst [smem:[#allocation15_spill]] %s4468_s24  ;;  %s467_s26 = sadd.s32 1, %s4464_s23 }
  0x13   : > { %5228 = sst [smem:[#allocation16_spill]] %s4616_s3  ;;  %s464_s27 = ssub.s32 %s4468_s24, %s4616_s3 }
  0x14   : > { %p477_p0 = scmp.ne.s32.totalorder %s4464_s23, %s4460_s22  ;;  %p465_p1 = scmp.eq.s32.totalorder %s464_s27, 0 }
  0x15   : > { %p478_p2 = scmp.eq.s32.totalorder %s4612_s2, 1  ;;  %p483_p3 = scmp.ne.s32.totalorder %s4460_s22, %s4456_s1 }
  0x16   : > { %p484_p4 = scmp.eq.s32.totalorder %s3475_s25, 1  ;;  %p3476_p7 = scmp.ge.s32.totalorder %s4468_s24, 1 }
  0x17   : > { %s4627_s28 = scalar_select %p465_p1, %s4464_s23, %s467_s26  }
  0x18   : > { %p4629_p5 = por %p478_p2, %p477_p0  ;;  %p4633_p6 = por %p484_p4, %p483_p3 }
  0x19   : > { %5229 = sst [smem:[#allocation17_spill]] %s4627_s28  ;;  %p491_p8 = scmp.lt.s32.totalorder %s4468_s24, 3 }
  0x1a   : > { %s5230_s4 = scalar_select %p4629_p5, 1, 0 }
  0x1b   : > { %s5232_s29 = scalar_select %p4633_p6, 1, 0 }
  0x1c   : > { %5231 = sst [smem:[#allocation18_spill]] %s5230_s4  ;;  %p5208_p9 = scmp.eq.s32.totalorder %s4612_s2, 0 }
  0x1d   : > { %5233 = sst [smem:[#allocation19_spill]] %s5232_s29  ;;  %p4640_p10 = pnand %p3476_p7, %p491_p8 }
  0x1e   : > { %s4470_s0 = smov [#allocation5]   ;;  %s4471_s26 = smov [#allocation2]  }
  0x1f   : > { %s5234_s30 = scalar_select %p4640_p10, 1, 0 }
  0x20   : > { %s534_s21 = sshll.u32 %s4470_s0, 4  ;;  %p4032_p11 = pneg %p4640_p10  ;;  %s535_s21 = int_to_ptr.vmem [resolvable:$true] %s534_s21 }
  0x21   : > { %s506_s27 = sshll.u32 %s4471_s26, 4  ;;  %s5236_s8 = sld [smem:[#allocation25_spill]]  ;;  %s4652_s27 = int_to_ptr.vmem [resolvable:$true] %s506_s27 }
  0x22   : > { %p4648_p12 = pnand %p5208_p9, %p4032_p11 }
  0x24   : > { %p4662_p0 = pneg %p4648_p12 }
  0x27   : > { %s4314_s3 = scalar_lea.hbm %s5236_s8, 4096 }
  0x28   : > { %p4315_p13 = scmp.ne.s32.totalorder %s5236_s8, %s4314_s3  ;;  %p4321_p3 = scmp.lt.u32.totalorder %s4314_s3, %s5236_s8 }
  0x2a   : > { %p4317_p1 = pnand %p4662_p0, %p4315_p13 }
  0x2c   : > { %p4318_p2 = pneg %p4317_p1 }
  0x2e   : > { %p4323_p4 = pnand %p4321_p3, %p4318_p2 }
  0x30   : > { %4326 = shalt.err (!%p4323_p4)
}
  0x31   : > { %s4327_s23 = scalar_lea.vmem %s535_s21, 4096  ;;  %p4335_p9 = scmp.lt.s32.totalorder %s535_s21, %s535_s21 }
  0x32   : > { %p4328_p7 = scmp.ne.s32.totalorder %s535_s21, %s4327_s23  ;;  %p4336_p6 = scmp.lt.s32.totalorder %s4327_s23, %s4327_s23 }
  0x34   : > { %p4330_p8 = pnand %p4328_p7, %p4662_p0  ;;  %p4337_p5 = por %p4336_p6, %p4335_p9 }
  0x36   : > { %p4331_p11 = pneg %p4330_p8 }
  0x38   : > { %p4338_p10 = pnand %p4337_p5, %p4331_p11 }
  0x3a   : > { %4341 = shalt.err (!%p4338_p10)
}
  0x3b   : > { %s4472_s1 = smov 128   ;;  %s4473_s28 = smov 8  }
  0x3c   : > { %4038 = dma.hbm_to_vmem [thread:$0]  (!%p4648_p12), %s5236_s8, 4096, %s535_s21, [#allocation6], %s4472_s1, %s4472_s1, %s4473_s28  }
  0x3d   : > { %s5238_s20 = sld [smem:[#allocation22_spill]] }
  0x43   : > { %s4342_s4 = scalar_lea.hbm %s5238_s20, 6144 }
  0x44   : > { %p4343_p13 = scmp.ne.s32.totalorder %s5238_s20, %s4342_s4  ;;  %p4349_p9 = scmp.lt.u32.totalorder %s4342_s4, %s5238_s20 }
  0x46   : > { %p4345_p5 = pnand %p4343_p13, %p4662_p0 }
  0x48   : > { %p4346_p6 = pneg %p4345_p5 }
  0x4a   : > { %p4351_p10 = pnand %p4349_p9, %p4346_p6 }
  0x4c   : > { %4354 = shalt.err (!%p4351_p10)
}
  0x4d   : > { %s4355_s21 = scalar_lea.vmem %s4652_s27, 6144  ;;  %p4363_p4 = scmp.lt.s32.totalorder %s4652_s27, %s4652_s27 }
  0x4e   : > { %p4356_p1 = scmp.ne.s32.totalorder %s4652_s27, %s4355_s21  ;;  %p4364_p7 = scmp.lt.s32.totalorder %s4355_s21, %s4355_s21 }
  0x50   : > { %p4358_p2 = pnand %p4356_p1, %p4662_p0  ;;  %p4365_p8 = por %p4364_p7, %p4363_p4 }
  0x52   : > { %p4359_p3 = pneg %p4358_p2 }
  0x54   : > { %p4366_p11 = pnand %p4365_p8, %p4359_p3 }
  0x56   : > { %4369 = shalt.err (!%p4366_p11)
}
  0x57   : > { %s4474_s17 = smov 192   ;;  %s4475_s19 = smov 12  }
  0x58   : > { %4035 = dma.hbm_to_vmem [thread:$0]  (!%p4648_p12), %s5238_s20, 6144, %s4652_s27, [#allocation3], %s4474_s17, %s4474_s17, %s4475_s19  }
  0x59   : > { %s4476_s1 = smov [#allocation7]   ;;  %s4370_s29 = scalar_lea.hbm %s5188_s10, 4096 }
  0x5a   : > { %s550_s28 = sshll.u32 %s4476_s1, 4  ;;  %p4371_p13 = scmp.ne.s32.totalorder %s5188_s10, %s4370_s29  ;;  %s551_s28 = int_to_ptr.vmem [resolvable:$true] %s550_s28 }
  0x5b   : > { %p4377_p9 = scmp.lt.u32.totalorder %s4370_s29, %s5188_s10 }
  0x5c   : > { %p4373_p5 = pnand %p4371_p13, %p4662_p0 }
  0x5e   : > { %p4374_p6 = pneg %p4373_p5 }
  0x60   : > { %p4379_p10 = pnand %p4377_p9, %p4374_p6 }
  0x62   : > { %4382 = shalt.err (!%p4379_p10)
}
  0x63   : > { %s4383_s27 = scalar_lea.vmem %s551_s28, 4096  ;;  %p4391_p4 = scmp.lt.s32.totalorder %s551_s28, %s551_s28 }
  0x64   : > { %p4384_p1 = scmp.ne.s32.totalorder %s551_s28, %s4383_s27  ;;  %p4392_p7 = scmp.lt.s32.totalorder %s4383_s27, %s4383_s27 }
  0x66   : > { %p4386_p2 = pnand %p4384_p1, %p4662_p0  ;;  %p4393_p8 = por %p4392_p7, %p4391_p4 }
  0x68   : > { %p4387_p3 = pneg %p4386_p2 }
  0x6a   : > { %p4394_p11 = pnand %p4393_p8, %p4387_p3 }
  0x6c   : > { %4397 = shalt.err (!%p4394_p11)
}
  0x6d   : > { %s4477_s17 = smov 64   ;;  %s4478_s19 = smov 4  }
  0x6e   : > { %4041 = dma.hbm_to_vmem [thread:$0]  (!%p4648_p12), %s5188_s10, 4096, %s551_s28, [#allocation6], %s4477_s17, %s4477_s17, %s4478_s19  }
  0x6f   : > { %p5239_p13 = scmp.ne.s32.totalorder %s5234_s30, 0 }
  0x70   : > { %p5240_p5 = scmp.eq.s32.totalorder (!%p5239_p13), %s4612_s2, 0 }
  0x71   : > { %600 = sbr.rel (%p5239_p13) target bundleno = 5192 (0x1448), region = 100 }
  0x78   : > { %4443 = dma.done.wait (%p5240_p5), [#allocation3], 6144   ;;  %p5241_p0 = pmov %p5240_p5 }
  0x7a   : > { %4445 = vsyncadd (%p5241_p0), [#allocation3], 4294961152  ;;  %p5242_p6 = pmov %p5241_p0 }
  0x7b   : > { %p5243_p9 = pmov %p5241_p0 }
  0x7c   : > { %4447 = dma.done.wait (%p5242_p6), [#allocation6], 8192  }
  0x7d   : > { %4449 = vsyncadd (%p5243_p9), [#allocation6], 4294959104  ;;  %v4479_v0 = vmov 0   ;;  %v4480_v1 = vmov 0.0   ;;  %v4100_v2 = vld [vmem:[#allocation2 + $0x4] ss:$12 sps:$4 sm:$0xff]   ;;  %v707_v30 = vlaneseq }
  0x7e   : > { %882 = vmatprep.mubr.bf16.mxu0 %v4479_v0  ;;  %3810 = vmatprep.subr.bf16.mxu1 %v4480_v1  ;;  %v4102_v3 = vld [vmem:[#allocation2] ss:$12 sps:$4 sm:$0xff]   ;;  %v4103_v4 = vld [vmem:[#allocation2 + $0x1c] ss:$12 sps:$4 sm:$0xff]   ;;  %v4105_v5 = vld [vmem:[#allocation2 + $0x18] ss:$12 sps:$4 sm:$0xff]  }
  0x7f   : > { %850 = vmatprep.subr.bf16.mxu0 %v4100_v2  ;;  %v4106_v6 = vld [vmem:[#allocation2 + $0x34] ss:$12 sps:$4 sm:$0xff]   ;;  %p664_p12 = scmp.lt.s32.totalorder %s4612_s2, 1  ;;  %v4108_v7 = vld [vmem:[#allocation2 + $0x30] ss:$12 sps:$4 sm:$0xff]   ;;  %s5244_s1 = sld [smem:[#allocation20_spill]] }
  0x80   : > { %851 = vmatpush1.bf16.msra.mxu0 %v4102_v3  ;;  %v4109_v8 = vld [vmem:[#allocation2 + $0x4c] ss:$12 sps:$4 sm:$0xff]   ;;  %v4111_v9 = vld [vmem:[#allocation2 + $0x48] ss:$12 sps:$4 sm:$0xff]   ;;  %v4112_v10 = vld [vmem:[#allocation2 + $0x64] ss:$12 sps:$4 sm:$0xff]  }
  0x81   : > { %852 = vmatprep.subr.bf16.mxu0 %v4103_v4  ;;  %s665_s30 = scalar_select %p664_p12, %s4612_s2, 1  ;;  %v4124_v11 = vld [vmem:[#allocation2 + $0x8] ss:$12 sps:$4 sm:$0xff]   ;;  %v4125_v12 = vld [vmem:[#allocation2 + $0x20] ss:$12 sps:$4 sm:$0xff]   ;;  %vm4481_vm0 = vmmov 0  }
  0x82   : > { %3811 = vmatpush3.bf16.msra.mxu1 %v4124_v11  ;;  %v4114_v13 = vld [vmem:[#allocation2 + $0x60] ss:$12 sps:$4 sm:$0xff]   ;;  %v4115_v14 = vld [vmem:[#allocation2 + $0x7c] ss:$12 sps:$4 sm:$0xff]   ;;  %v4126_v15 = vld [vmem:[#allocation2 + $0x38] ss:$12 sps:$4 sm:$0xff]   ;;  %3826 = vmatprep.mubr.msk.bf16.mxu1 %vm4481_vm0, %v4480_v1 }
  0x83   : > { %s3485_s25 = sshll.u32 %s665_s30, 3  ;;  %3812 = vmatprep.subr.bf16.mxu1 %v4480_v1  ;;  %v4117_v16 = vld [vmem:[#allocation2 + $0x78] ss:$12 sps:$4 sm:$0xff]   ;;  %v4118_v17 = vld [vmem:[#allocation2 + $0x94] ss:$12 sps:$4 sm:$0xff]   ;;  %s5245_s29 = sld [smem:[#allocation21_spill]] }
  0x84   : > { %853 = vmatpush1.bf16.msra.mxu0 %v4105_v5  ;;  %v4127_v18 = vld [vmem:[#allocation2 + $0x50] ss:$12 sps:$4 sm:$0xff]   ;;  %v4121_v22 = vld [vmem:[#allocation2 + $0xac] ss:$12 sps:$4 sm:$0xff]   ;;  %v4128_v23 = vld [vmem:[#allocation2 + $0x68] ss:$12 sps:$4 sm:$0xff]  }
  0x85   : > { %854 = vmatprep.subr.bf16.mxu0 %v4106_v6  ;;  %s667_s28 = scalar_lea.vmem %s5244_s1, %s3485_s25  ;;  %v4120_v19 = vld [vmem:[#allocation2 + $0x90] ss:$12 sps:$4 sm:$0xff]   ;;  %v4123_v24 = vld [vmem:[#allocation2 + $0xa8] ss:$12 sps:$4 sm:$0xff]   ;;  %v4129_v26 = vld [vmem:[#allocation2 + $0x80] ss:$12 sps:$4 sm:$0xff]  }
  0x86   : > { %3813 = vmatpush3.bf16.msra.mxu1 %v4125_v12  ;;  %v669_v20 = vld [vmem:[%s667_s28] sm:$0xff]  ;;  %v4131_v29 = vld [vmem:[#allocation2 + $0xb0] ss:$12 sps:$4 sm:$0xff]   ;;  %v4758_v31 = vshrl.u32 %v707_v30, 7  ;;  %s5246_s21 = sld [smem:[#allocation23_spill]]  ;;  %s4482_s27 = smov 96  }
  0x87   : > { %3814 = vmatprep.subr.bf16.mxu1 %v4480_v1  ;;  %v4130_v28 = vld [vmem:[#allocation2 + $0x98] ss:$12 sps:$4 sm:$0xff]   ;;  %vm969_vm1 = vcmask 261120   ;;  %s4483_s17 = smov 32   ;;  %s4484_s19 = smov 64   ;;  %vm1210_vm2 = vcmask 1043456  }
  0x88   : > { %855 = vmatpush1.bf16.msra.mxu0 %v4108_v7  ;;  %v4761_v32 = vsub.s32 0, %v4758_v31  ;;  %v4767_v34 = vsub.s32 1, %v4758_v31  ;;  %v717_v50 = vsub.s32 2, %v4758_v31  ;;  %vm1154_vm3 = vcmask 64512   ;;  %s5247_s30 = sld [smem:[#allocation24_spill]]  ;;  %s5248_s24 = sld [smem:[#allocation13_spill]] }
  0x89   : > { %856 = vmatprep.subr.bf16.mxu0 %v4109_v8  ;;  %v670_v21 = vld [vmem:[%s5245_s29] sm:$0xff]  ;;  %vm1405_vm4 = vcmask 523264   ;;  %vm1407_vm5 = vcmask 785408   ;;  %s5250_s8 = sld [smem:[#allocation27_spill]]  ;;  %s3681_s0 = sshll.u32 %s4612_s2, 4  ;;  %vm3374_vm6 = vcmask 24576  }
  0x8a   : > { %3815 = vmatpush3.bf16.msra.mxu1 %v4126_v15  ;;  %v4742_v25 = vadd.f32 %v670_v21, %v669_v20  ;;  %s5251_s25 = sld [smem:[#allocation18_spill]]  ;;  %s5252_s29 = sld [smem:[#allocation28_spill]] }
  0x8b   : > { %3816 = vmatprep.subr.bf16.mxu1 %v4480_v1  ;;  %s4485_s23 = smov [#allocation8]  }
  0x8c   : > { %857 = vmatpush1.bf16.msra.mxu0 %v4111_v9  ;;  %v704_v27 = vpack.c.bf16 %v4742_v25, %v4742_v25  ;;  %v705_v33 = vld [vmem:[%s5246_s21] sm:$0x7] }
  0x8d   : > { %858 = vmatprep.subr.bf16.mxu0 %v4112_v10  ;;  %v710_v35 = vrot.slane %v705_v33, %v4761_v32  ;;  %v714_v36 = vrot.slane %v705_v33, %v4767_v34  ;;  %v718_v54 = vrot.slane %v705_v33, %v717_v50 }
  0x8e   : > { %3817 = vmatpush3.bf16.msra.mxu1 %v4127_v18 }
  0x8f   : > { %3818 = vmatprep.subr.bf16.mxu1 %v4480_v1 }
  0x90   : > { %859 = vmatpush1.bf16.msra.mxu0 %v4114_v13  ;;  %s5136_s26 = scalar_lea.hbm %s5252_s29, %s3681_s0  ;;  %p5253_p1 = scmp.ne.s32.totalorder %s5251_s25, 0 }
  0x91   : > { %860 = vmatprep.subr.bf16.mxu0 %v4115_v14 }
  0x92   : > { %3819 = vmatpush3.bf16.msra.mxu1 %v4128_v23 }
  0x93   : > { %3820 = vmatprep.subr.bf16.mxu1 %v4480_v1 }
  0x94   : > { %861 = vmatpush1.bf16.msra.mxu0 %v4117_v16 }
  0x95   : > { %862 = vmatprep.subr.bf16.mxu0 %v4118_v17 }
  0x96   : > { %3821 = vmatpush3.bf16.msra.mxu1 %v4129_v26 }
  0x97   : > { %3822 = vmatprep.subr.bf16.mxu1 %v4480_v1 }
  0x98   : > { %863 = vmatpush1.bf16.msra.mxu0 %v4120_v19 }
  0x99   : > { %864 = vmatprep.subr.bf16.mxu0 %v4121_v22 }
  0x9a   : > { %3823 = vmatpush3.bf16.msra.mxu1 %v4130_v28 }
  0x9b   : > { %3824 = vmatprep.subr.bf16.mxu1 %v4480_v1 }
  0x9c   : > { %865 = vmatpush1.bf16.msra.mxu0 %v4123_v24 }
  0x9d   : > { %3842 = vmatprep.subr.bf16.mxu0 %v4480_v1 }
  0x9e   : > { %3825 = vmatpush3.bf16.msra.mxu1 %v4131_v29 }
  0x9f   : > { %883 = vmatmul.mubr.bf16.vlgmr.msra.gmra.mrb[0].mxu0 %v704_v27  ;;  %3830 = vmatprep.subr.bf16.mxu1 %v4480_v1 }
  0xa0   : > { %3844 = vmatprep.mubr.msk.bf16.mxu0 %vm4481_vm0, %v4480_v1 }
  0xa1   : > { %3827 = vmatmul.mubr.bf16.vlgmr.msra.gmra.mrb[0].mxu1 %v704_v27 }
  0xa2   : > { %3832 = vmatprep.mubr.msk.bf16.mxu1 %vm4481_vm0, %v4480_v1 }
 0x172   : > { %v884_v37 = vpop.f32.mrb[0].mxu0 }
 0x173   : > { %v885_v38 = vadd.f32 %v884_v37, %v710_v35  ;;  %v886_v39 = vpop.f32.mrb[1].mxu0 }
 0x174   : > { %v887_v40 = vadd.f32 %v886_v39, %v714_v36  ;;  %v888_v41 = vpop.f32.mrb[2].mxu0  ;;  %v925_v46 = vpop.f32.mrb[0].mxu1 }
 0x175   : > { %v889_v42 = vpop.f32.mrb[3].mxu0  ;;  %932 = vrot.lane.b32.xlu1 %v885_v38, %s4482_s27  ;;  %v961_v45 = vpack.c.bf16 %v885_v38, %v885_v38  ;;  %v3828_v47 = vpop.f32.mrb[1].mxu1  ;;  %v4787_v59 = vadd.f32 %v925_v46, %v718_v54 }
 0x176   : > { %942 = vrot.lane.b32.xlu0 %v887_v40, %s4482_s27  ;;  %v965_v43 = vpack.c.bf16 %v887_v40, %v887_v40  ;;  %v928_v48 = vpop.f32.mrb[2].mxu1 }
 0x177   : > { %v3829_v49 = vpop.f32.mrb[3].mxu1  ;;  %v1203_v63 = vpack.c.bf16 %v4787_v59, %v4787_v59 }
 0x178   : > { %v974_v44 = vsel %vm969_vm1, %v965_v43, 0 }
 0x179   : > { %3831 = vmatpush3.bf16.xpose.msra.mxu1 %v974_v44  ;;  %948 = vrot.lane.b32.xlu1 %v887_v40, %s4483_s17  ;;  %v1212_v5 = vsel %vm1210_vm2, %v1203_v63, 0 }
 0x17a   : > { %945 = vrot.lane.b32.xlu0 %v887_v40, %s4484_s19  ;;  %3836 = vmatprep.subr.bf16.mxu1 %v4480_v1 }
 0x17d   : > { %938 = vrot.lane.b32.xlu1 %v885_v38, %s4483_s17 }
 0x17e   : > { %935 = vrot.lane.b32.xlu0 %v885_v38, %s4484_s19 }
 0x180   : > { %3833 = vmatmul.mubr.msk.bf16.vlgmr.msra.gmra.mrb[4].mxu1 %vm969_vm1, %v961_v45 }
 0x181   : > { %3838 = vmatprep.mubr.msk.bf16.mxu1 %vm4481_vm0, %v4480_v1 }
 0x1e7   : > { %v933_v51 = vpop.permute.xlu1 %932 }
 0x1e8   : > { %v943_v52 = vpop.permute.xlu0 %942  ;;  %v962_v62 = vpack.c.bf16 %v933_v51, %v933_v51 }
 0x1e9   : > { %v966_v53 = vpack.c.bf16 %v943_v52, %v943_v52 }
 0x1eb   : > { %v1020_v55 = vsel %vm969_vm1, %v966_v53, 0  ;;  %v949_v56 = vpop.permute.xlu1 %948 }
 0x1ec   : > { %v946_v57 = vpop.permute.xlu0 %945  ;;  %3837 = vmatpush3.bf16.xpose.msra.mxu1 %v1020_v55  ;;  %v968_v60 = vpack.c.bf16 %v949_v56, %v949_v56 }
 0x1ed   : > { %v967_v58 = vpack.c.bf16 %v946_v57, %v946_v57  ;;  %3848 = vmatprep.subr.bf16.mxu1 %v4480_v1 }
 0x1ee   : > { %v1112_v3 = vsel %vm969_vm1, %v968_v60, 0 }
 0x1ef   : > { %v1066_v61 = vsel %vm969_vm1, %v967_v58, 0  ;;  %v939_v6 = vpop.permute.xlu1 %938 }
 0x1f0   : > { %3843 = vmatpush3.bf16.xpose.msra.mxu0 %v1066_v61  ;;  %v936_v2 = vpop.permute.xlu0 %935  ;;  %v964_v7 = vpack.c.bf16 %v939_v6, %v939_v6 }
 0x1f1   : > { %3854 = vmatprep.subr.bf16.mxu0 %v4480_v1  ;;  %v963_v4 = vpack.c.bf16 %v936_v2, %v936_v2 }
 0x1f3   : > { %3839 = vmatmul.mubr.msk.bf16.vlgmr.msra.gmra.mrb[8].mxu1 %vm969_vm1, %v962_v62 }
 0x1f4   : > { %3849 = vmatpush3.bf16.xpose.msra.mxu1 %v1112_v3  ;;  %3850 = vmatprep.mubr.msk.bf16.mxu1 %vm4481_vm0, %v4480_v1 }
 0x1f5   : > { %3860 = vmatprep.subr.bf16.mxu1 %v4480_v1 }
 0x1f7   : > { %3845 = vmatmul.mubr.msk.bf16.vlgmr.msra.gmra.mrb[4].mxu0 %vm969_vm1, %v963_v4 }
 0x1f8   : > { %3855 = vmatpush3.bf16.msra.mxu0 %v1212_v5  ;;  %3856 = vmatprep.mubr.msk.bf16.mxu0 %vm4481_vm0, %v4480_v1 }
 0x1f9   : > { %3866 = vmatprep.subr.bf16.mxu0 %v4480_v1 }
 0x1fb   : > { %3851 = vmatmul.mubr.msk.bf16.vlgmr.msra.gmra.mrb[12].mxu1 %vm969_vm1, %v964_v7 }
 0x1fc   : > { %3862 = vmatprep.mubr.msk.bf16.mxu1 %vm4481_vm0, %v4480_v1 }
 0x253   : > { %v1010_v8 = vpop.f32.mrb[4].mxu1 }
 0x254   : > { %v3834_v9 = vpop.f32.mrb[5].mxu1  ;;  %v1155_v10 = vsel %vm1154_vm3, %v1010_v8, -inf }
 0x255   : > { %1156 = vmax.xlane.f32.xlu0 %v1155_v10  ;;  %v1013_v11 = vpop.f32.mrb[6].mxu1 }
 0x256   : > { %v3835_v12 = vpop.f32.mrb[7].mxu1 }
 0x2c6   : > { %v1056_v13 = vpop.f32.mrb[8].mxu1 }
 0x2c7   : > { %v3840_v14 = vpop.f32.mrb[9].mxu1  ;;  %v1158_v15 = vsel %vm1154_vm3, %v1056_v13, -inf }
 0x2c8   : > { %1159 = vmax.xlane.f32.xlu1 %v1158_v15  ;;  %v1059_v16 = vpop.f32.mrb[10].mxu1 }
 0x2c9   : > { %v3841_v17 = vpop.f32.mrb[11].mxu1  ;;  %v4132_v16 = vld [vmem:[%s5247_s30] sm:$0xff]  }
 0x2ca   : > { %v1102_v18 = vpop.f32.mrb[4].mxu0  ;;  %v4133_v17 = vld [vmem:[%s5247_s30 + $0x8] sm:$0xff]  }
 0x2cb   : > { %v3846_v19 = vpop.f32.mrb[5].mxu0  ;;  %v1161_v20 = vsel %vm1154_vm3, %v1102_v18, -inf }
 0x2cc   : > { %v1105_v21 = vpop.f32.mrb[6].mxu0  ;;  %1162 = vmax.xlane.f32.xlu0 %v1161_v20  ;;  %v4135_v19 = vld [vmem:[%s5247_s30 + $0x18] sm:$0xff]  }
 0x2cd   : > { %v3847_v22 = vpop.f32.mrb[7].mxu0 }
 0x2ce   : > { %v1148_v23 = vpop.f32.mrb[12].mxu1 }
 0x2cf   : > { %v3852_v24 = vpop.f32.mrb[13].mxu1  ;;  %v1164_v26 = vsel %vm1154_vm3, %v1148_v23, -inf }
 0x2d0   : > { %1165 = vmax.xlane.f32.xlu0 %v1164_v26  ;;  %v1151_v27 = vpop.f32.mrb[14].mxu1  ;;  %v4137_v26 = vld [vmem:[%s5247_s30 + $0x28] sm:$0xff]  }
 0x2d1   : > { %v3853_v28 = vpop.f32.mrb[15].mxu1  ;;  %v4138_v27 = vld [vmem:[%s5247_s30 + $0x30] sm:$0xff]  }
 0x2d2   : > { %v4139_v28 = vld [vmem:[%s5247_s30 + $0x38] sm:$0xff]  }
 0x2d9   : > { %952 = vrot.lane.b32.xlu1 %v4787_v59, %s4482_s27 }
 0x2e2   : > { %v1157_v29 = vpop.xlane.xlu0 %1156 }
 0x2e3   : > { %v1167_v30 = vsub.f32 %v1010_v8, %v1157_v29 }
 0x2e5   : > { %v1171_v33 = vmul.f32 1.442695, %v1167_v30 }
 0x2e7   : > { %4272 = vpow2.f32 %v1171_v33 }
 0x2f1   : > { %v4273_v35 = vpop.eup %4272 }
 0x2f2   : > { %v1179_v36 = vsel %vm1154_vm3, %v4273_v35, 0.0 }
 0x2fd   : > { %1180 = vadd.xlane.f32.xlu1 %v1179_v36 }
 0x355   : > { %v1160_v37 = vpop.xlane.xlu1 %1159 }
 0x356   : > { %v1168_v38 = vsub.f32 %v1056_v13, %v1160_v37 }
 0x358   : > { %v1173_v39 = vmul.f32 1.442695, %v1168_v38 }
 0x359   : > { %v1163_v40 = vpop.xlane.xlu0 %1162  ;;  %v953_v41 = vpop.permute.xlu1 %952 }
 0x35a   : > { %4274 = vpow2.f32 %v1173_v39  ;;  %v1169_v42 = vsub.f32 %v1102_v18, %v1163_v40  ;;  %v1204_v43 = vpack.c.bf16 %v953_v41, %v953_v41  ;;  %v4134_v18 = vld [vmem:[%s5247_s30 + $0x10] sm:$0xff]  }
 0x35c   : > { %v1175_v44 = vmul.f32 1.442695, %v1169_v42  ;;  %v1258_v45 = vsel %vm1210_vm2, %v1204_v43, 0 }
 0x35d   : > { %3861 = vmatpush3.bf16.msra.mxu1 %v1258_v45  ;;  %v1166_v46 = vpop.xlane.xlu0 %1165 }
 0x35e   : > { %4276 = vpow2.f32 %v1175_v44  ;;  %v1170_v47 = vsub.f32 %v1148_v23, %v1166_v46  ;;  %3872 = vmatprep.subr.bf16.mxu1 %v4480_v1  ;;  %v4136_v23 = vld [vmem:[%s5247_s30 + $0x20] sm:$0xff]  }
 0x360   : > { %v1177_v48 = vmul.f32 1.442695, %v1170_v47 }
 0x362   : > { %4278 = vpow2.f32 %v1177_v48 }
 0x364   : > { %v4275_v49 = vpop.eup %4274 }
 0x365   : > { %v1182_v51 = vsel %vm1154_vm3, %v4275_v49, 0.0 }
 0x366   : > { %1183 = vadd.xlane.f32.xlu0 %v1182_v51 }
 0x368   : > { %v4277_v52 = vpop.eup %4276 }
 0x369   : > { %v1185_v53 = vsel %vm1154_vm3, %v4277_v52, 0.0 }
 0x36a   : > { %1186 = vadd.xlane.f32.xlu1 %v1185_v53  ;;  %v4142_v53 = vld [vmem:[#allocation5 + $0x4] ss:$8 sps:$4 sm:$0xff]  }
 0x36c   : > { %v4279_v54 = vpop.eup %4278 }
 0x36d   : > { %v1188_v55 = vsel %vm1154_vm3, %v4279_v54, 0.0 }
 0x36e   : > { %1189 = vadd.xlane.f32.xlu0 %v1188_v55  ;;  %v4143_v55 = vld [vmem:[#allocation5 + $0x10] ss:$8 sps:$4 sm:$0xff]  }
 0x37b   : > { %958 = vrot.lane.b32.xlu1 %v4787_v59, %s4483_s17 }
 0x384   : > { %955 = vrot.lane.b32.xlu0 %v4787_v59, %s4484_s19 }
 0x38a   : > { %v1181_v56 = vpop.xlane.xlu1 %1180 }
 0x38b   : > { %4280 = vrcp.f32 %v1181_v56  ;;  %v3518_v56 = vld [vmem:[%s5183_s5] ss:$0 sm:$0xff] }
 0x395   : > { %v4281_v57 = vpop.eup %4280 }
 0x396   : > { %v1195_v58 = vmul.f32 %v4281_v57, %v4273_v35 }
 0x398   : > { %v1199_v60 = vpack.c.bf16 %v1195_v58, %v1195_v58 }
 0x39a   : > { %3857 = vmatmul.mubr.msk.bf16.vlgmr.msra.gmra.mrb[8].mxu0 %vm1154_vm3, %v1199_v60 }
 0x39b   : > { %3868 = vmatprep.mubr.msk.bf16.mxu0 %vm4481_vm0, %v4480_v1 }
 0x3f3   : > { %v1184_v61 = vpop.xlane.xlu0 %1183 }
 0x3f4   : > { %4282 = vrcp.f32 %v1184_v61 }
 0x3f7   : > { %v1187_v62 = vpop.xlane.xlu1 %1186 }
 0x3f8   : > { %4284 = vrcp.f32 %v1187_v62 }
 0x3fb   : > { %v1190_v63 = vpop.xlane.xlu0 %1189  ;;  %v959_v2 = vpop.permute.xlu1 %958 }
 0x3fc   : > { %4286 = vrcp.f32 %v1190_v63  ;;  %v1206_v59 = vpack.c.bf16 %v959_v2, %v959_v2 }
 0x3fe   : > { %v4283_v3 = vpop.eup %4282  ;;  %v1350_v11 = vsel %vm1210_vm2, %v1206_v59, 0  ;;  %v4151_v59 = vld [vmem:[#allocation5 + $0x34] ss:$8 sps:$4 sm:$0xff]  }
 0x3ff   : > { %v1196_v4 = vmul.f32 %v4283_v3, %v4275_v49  ;;  %v956_v5 = vpop.permute.xlu0 %955  ;;  %v4148_v3 = vld [vmem:[#allocation5 + $0x24] ss:$8 sps:$4 sm:$0xff]  }
 0x400   : > { %v1205_v6 = vpack.c.bf16 %v956_v5, %v956_v5  ;;  %v4149_v5 = vld [vmem:[#allocation5 + $0x30] ss:$8 sps:$4 sm:$0xff]  }
 0x401   : > { %v1200_v7 = vpack.c.bf16 %v1196_v4, %v1196_v4  ;;  %v4146_v4 = vld [vmem:[#allocation5 + $0x20] ss:$8 sps:$4 sm:$0xff]  }
 0x402   : > { %v4285_v8 = vpop.eup %4284  ;;  %v1304_v9 = vsel %vm1210_vm2, %v1205_v6, 0  ;;  %v4154_v6 = vld [vmem:[#allocation5 + $0x44] ss:$8 sps:$4 sm:$0xff]  }
 0x403   : > { %v1197_v10 = vmul.f32 %v4285_v8, %v4277_v52  ;;  %3863 = vmatmul.mubr.msk.bf16.vlgmr.msra.gmra.mrb[16].mxu1 %vm1154_vm3, %v1200_v7  ;;  %3867 = vmatpush3.bf16.msra.mxu0 %v1304_v9  ;;  %v4140_v52 = vld [vmem:[#allocation5] ss:$8 sps:$4 sm:$0xff]   ;;  %v4155_v8 = vld [vmem:[#allocation5 + $0x50] ss:$8 sps:$4 sm:$0xff]   ;;  %v4160_v9 = vld [vmem:[#allocation5 + $0x64] ss:$8 sps:$4 sm:$0xff]  }
 0x404   : > { %3873 = vmatpush3.bf16.msra.mxu1 %v1350_v11  ;;  %3874 = vmatprep.mubr.msk.bf16.mxu1 %vm4481_vm0, %v4480_v1  ;;  %v4152_v7 = vld [vmem:[#allocation5 + $0x40] ss:$8 sps:$4 sm:$0xff]   ;;  %v4163_v11 = vld [vmem:[#allocation5 + $0x74] ss:$8 sps:$4 sm:$0xff]  }
 0x405   : > { %v1201_v12 = vpack.c.bf16 %v1197_v10, %v1197_v10  ;;  %3878 = vmatprep.subr.bf16.mxu0 %v4480_v1  ;;  %1661 = vmatprep.subr.bf16.mxu1 %v4142_v53  ;;  %v4158_v10 = vld [vmem:[#allocation5 + $0x60] ss:$8 sps:$4 sm:$0xff]  }
 0x406   : > { %v4287_v13 = vpop.eup %4286 }
 0x407   : > { %v1198_v14 = vmul.f32 %v4287_v13, %v4279_v54  ;;  %3869 = vmatmul.mubr.msk.bf16.vlgmr.msra.gmra.mrb[12].mxu0 %vm1154_vm3, %v1201_v12  ;;  %v4145_v54 = vld [vmem:[#allocation5 + $0x14] ss:$8 sps:$4 sm:$0xff]   ;;  %v4161_v12 = vld [vmem:[#allocation5 + $0x70] ss:$8 sps:$4 sm:$0xff]   ;;  %v4164_v13 = vld [vmem:[#allocation7 + $0x40] sm:$0xff]  }
 0x408   : > { %3894 = vmatprep.mubr.msk.bf16.mxu0 %vm4481_vm0, %v4480_v1  ;;  %3879 = vmatpush3.bf16.msra.mxu0 %v4132_v16  ;;  %v4167_v16 = vld [vmem:[#allocation7 + $0x8] sm:$0xff]  }
 0x409   : > { %v1202_v15 = vpack.c.bf16 %v1198_v14, %v1198_v14  ;;  %3880 = vmatprep.subr.bf16.mxu0 %v4480_v1  ;;  %v4165_v14 = vld [vmem:[#allocation7] sm:$0xff]  }
 0x40b   : > { %3875 = vmatmul.mubr.msk.bf16.vlgmr.msra.gmra.mrb[20].mxu1 %vm1154_vm3, %v1202_v15  ;;  %v4166_v15 = vld [vmem:[#allocation7 + $0x48] sm:$0xff]  }
 0x40c   : > { %1693 = vmatprep.mubr.bf16.mxu1 %v4479_v0  ;;  %3881 = vmatpush3.bf16.msra.mxu0 %v4133_v17  ;;  %v4168_v17 = vld [vmem:[#allocation7 + $0x50] sm:$0xff]  }
 0x40d   : > { %3882 = vmatprep.subr.bf16.mxu0 %v4480_v1  ;;  %1662 = vmatpush1.bf16.msra.mxu1 %v4140_v52 }
 0x40e   : > { %1663 = vmatprep.subr.bf16.mxu1 %v4145_v54 }
 0x410   : > { %3883 = vmatpush3.bf16.msra.mxu0 %v4134_v18  ;;  %v4169_v18 = vld [vmem:[#allocation7 + $0x10] sm:$0xff]  }
 0x411   : > { %3884 = vmatprep.subr.bf16.mxu0 %v4480_v1  ;;  %1664 = vmatpush1.bf16.msra.mxu1 %v4143_v55 }
 0x412   : > { %1665 = vmatprep.subr.bf16.mxu1 %v4148_v3  ;;  %v4183_v3 = vld [vmem:[#allocation2 + $0xc8] ss:$12 sps:$4 sm:$0xff]  }
 0x414   : > { %3885 = vmatpush3.bf16.msra.mxu0 %v4135_v19  ;;  %v4170_v19 = vld [vmem:[#allocation7 + $0x58] sm:$0xff]  }
 0x415   : > { %3886 = vmatprep.subr.bf16.mxu0 %v4480_v1  ;;  %1666 = vmatpush1.bf16.msra.mxu1 %v4146_v4 }
 0x416   : > { %1667 = vmatprep.subr.bf16.mxu1 %v4151_v59  ;;  %v3545_v59 = vld [vmem:[%s5189_s11] ss:$0 sm:$0xff] }
 0x418   : > { %3887 = vmatpush3.bf16.msra.mxu0 %v4136_v23  ;;  %v4174_v23 = vld [vmem:[#allocation7 + $0x68] sm:$0xff]  }
 0x419   : > { %3888 = vmatprep.subr.bf16.mxu0 %v4480_v1  ;;  %1668 = vmatpush1.bf16.msra.mxu1 %v4149_v5 }
 0x41a   : > { %1669 = vmatprep.subr.bf16.mxu1 %v4154_v6 }
 0x41c   : > { %3889 = vmatpush3.bf16.msra.mxu0 %v4137_v26 }
 0x41d   : > { %3890 = vmatprep.subr.bf16.mxu0 %v4480_v1  ;;  %1670 = vmatpush1.bf16.msra.mxu1 %v4152_v7 }
 0x420   : > { %3891 = vmatpush3.bf16.msra.mxu0 %v4138_v27 }
 0x421   : > { %3892 = vmatprep.subr.bf16.mxu0 %v4480_v1 }
 0x424   : > { %3893 = vmatpush3.bf16.msra.mxu0 %v4139_v28 }
 0x425   : > { %3718 = vmatprep.subr.bf16.mxu0 %v4164_v13  ;;  %v4187_v13 = vld [vmem:[#allocation2 + $0xe0] ss:$12 sps:$4 sm:$0xff]  }
 0x46d   : > { %v1248_v20 = vpop.f32.mrb[8].mxu0 }
 0x46e   : > { %v3858_v21 = vpop.f32.mrb[9].mxu0 }
 0x46f   : > { %v1251_v22 = vpop.f32.mrb[10].mxu0  ;;  %v4172_v21 = vld [vmem:[#allocation7 + $0x60] sm:$0xff]  }
 0x470   : > { %v3859_v24 = vpop.f32.mrb[11].mxu0  ;;  %v4173_v22 = vld [vmem:[#allocation7 + $0x20] sm:$0xff]  }
 0x471   : > { %v4175_v24 = vld [vmem:[#allocation7 + $0x28] sm:$0xff]  }
 0x4d6   : > { %v1294_v29 = vpop.f32.mrb[16].mxu1 }
 0x4d7   : > { %1393 = vrot.lane.b32.xlu1 %v1294_v29, %s4483_s17  ;;  %v3864_v30 = vpop.f32.mrb[17].mxu1 }
 0x4d8   : > { %v1297_v33 = vpop.f32.mrb[18].mxu1 }
 0x4d9   : > { %v3865_v35 = vpop.f32.mrb[19].mxu1 }
 0x4da   : > { %v1340_v36 = vpop.f32.mrb[12].mxu0 }
 0x4db   : > { %1397 = vrot.lane.b32.xlu0 %v1340_v36, %s4484_s19  ;;  %v3870_v37 = vpop.f32.mrb[13].mxu0 }
 0x4dc   : > { %v1343_v38 = vpop.f32.mrb[14].mxu0 }
 0x4dd   : > { %v3871_v39 = vpop.f32.mrb[15].mxu0  ;;  %v3527_v38 = vld [vmem:[%s5184_s6] ss:$0 sm:$0xff] }
 0x4de   : > { %v1386_v40 = vpop.f32.mrb[20].mxu1 }
 0x4df   : > { %1401 = vrot.lane.b32.xlu1 %v1386_v40, %s4482_s27  ;;  %v3876_v41 = vpop.f32.mrb[21].mxu1  ;;  %v3528_v40 = vld [vmem:[%s5185_s7] ss:$0 sm:$0xff] }
 0x4e0   : > { %v1389_v42 = vpop.f32.mrb[22].mxu1 }
 0x4e1   : > { %v3877_v43 = vpop.f32.mrb[23].mxu1 }
 0x549   : > { %v1394_v44 = vpop.permute.xlu1 %1393 }
 0x54a   : > { %v1404_v46 = vsel %vm969_vm1, %v1248_v20, %v1394_v44  ;;  %v4171_v20 = vld [vmem:[#allocation7 + $0x18] sm:$0xff]   ;;  %v4176_v44 = vld [vmem:[#allocation7 + $0x70] sm:$0xff]  }
 0x54d   : > { %v1398_v45 = vpop.permute.xlu0 %1397 }
 0x54e   : > { %v1406_v47 = vsel %vm1405_vm4, %v1404_v46, %v1398_v45  ;;  %v4177_v45 = vld [vmem:[#allocation7 + $0x30] sm:$0xff]   ;;  %v4178_v46 = vld [vmem:[#allocation7 + $0x78] sm:$0xff]  }
 0x551   : > { %v1402_v48 = vpop.permute.xlu1 %1401 }
 0x552   : > { %v1408_v49 = vsel %vm1407_vm5, %v1406_v47, %v1402_v48  ;;  %v4179_v47 = vld [vmem:[#allocation7 + $0x38] sm:$0xff]   ;;  %v1569_v48 = vld [vmem:[%s5187_s9] sm:$0x3] }
 0x553   : > { %v1425_v51 = vpack.c.bf16 %v1408_v49, %v1408_v49  ;;  %v1574_v49 = vrot.slane %v1569_v48, %v4761_v32 }
 0x555   : > { %3895 = vmatmul.mubr.bf16.vlgmr.msra.gmra.mrb[16].mxu0 %v1425_v51  ;;  %v1578_v51 = vrot.slane %v1569_v48, %v4767_v34 }
 0x556   : > { %3719 = vmatpush3.bf16.msra.mxu0 %v4165_v14  ;;  %v4190_v14 = vld [vmem:[#allocation2 + $0xf4] ss:$12 sps:$4 sm:$0xff]  }
 0x557   : > { %3720 = vmatprep.subr.bf16.mxu0 %v4166_v15  ;;  %v4188_v15 = vld [vmem:[#allocation2 + $0xf0] ss:$12 sps:$4 sm:$0xff]  }
 0x55a   : > { %3721 = vmatpush3.bf16.msra.mxu0 %v4167_v16  ;;  %v4191_v16 = vld [vmem:[#allocation2 + $0xf8] ss:$12 sps:$4 sm:$0xff]  }
 0x55b   : > { %3722 = vmatprep.subr.bf16.mxu0 %v4168_v17  ;;  %v4194_v17 = vld [vmem:[#allocation2 + $0x10c] ss:$12 sps:$4 sm:$0xff]  }
 0x55e   : > { %3723 = vmatpush3.bf16.msra.mxu0 %v4169_v18  ;;  %v4192_v18 = vld [vmem:[#allocation2 + $0x108] ss:$12 sps:$4 sm:$0xff]  }
 0x55f   : > { %3724 = vmatprep.subr.bf16.mxu0 %v4170_v19  ;;  %v4195_v19 = vld [vmem:[#allocation2 + $0x110] ss:$12 sps:$4 sm:$0xff]  }
 0x562   : > { %3725 = vmatpush3.bf16.msra.mxu0 %v4171_v20  ;;  %v4198_v20 = vld [vmem:[#allocation2 + $0x124] ss:$12 sps:$4 sm:$0xff]  }
 0x563   : > { %3726 = vmatprep.subr.bf16.mxu0 %v4172_v21  ;;  %v4196_v21 = vld [vmem:[#allocation2 + $0x120] ss:$12 sps:$4 sm:$0xff]  }
 0x566   : > { %3727 = vmatpush3.bf16.msra.mxu0 %v4173_v22  ;;  %v4199_v22 = vld [vmem:[#allocation2 + $0x128] ss:$12 sps:$4 sm:$0xff]  }
 0x567   : > { %3728 = vmatprep.subr.bf16.mxu0 %v4174_v23  ;;  %v4202_v23 = vld [vmem:[#allocation2 + $0x13c] ss:$12 sps:$4 sm:$0xff]  }
 0x56a   : > { %3729 = vmatpush3.bf16.msra.mxu0 %v4175_v24  ;;  %v4200_v24 = vld [vmem:[#allocation2 + $0x138] ss:$12 sps:$4 sm:$0xff]  }
 0x56b   : > { %3730 = vmatprep.subr.bf16.mxu0 %v4176_v44 }
 0x56e   : > { %3731 = vmatpush3.bf16.msra.mxu0 %v4177_v45  ;;  %v3562_v45 = vld [vmem:[%s5190_s12] ss:$0 sm:$0xff] }
 0x56f   : > { %3732 = vmatprep.subr.bf16.mxu0 %v4178_v46 }
 0x572   : > { %3733 = vmatpush3.bf16.msra.mxu0 %v4179_v47  ;;  %v3563_v47 = vld [vmem:[%s5191_s13] ss:$0 sm:$0xff] }
 0x573   : > { %3898 = vmatprep.subr.bf16.mxu0 %v4480_v1 }
 0x628   : > { %v1515_v57 = vpop.f32.mrb[16].mxu0 }
 0x629   : > { %v1516_v58 = vadd.f32 %v3518_v56, %v1515_v57  ;;  %v3896_v60 = vpop.f32.mrb[17].mxu0 }
 0x62a   : > { %v1518_v61 = vpop.f32.mrb[18].mxu0 }
 0x62b   : > { %v4877_v62 = vadd.f32 %v1516_v58, %v4742_v25  ;;  %v3897_v63 = vpop.f32.mrb[19].mxu0  ;;  %v4157_v25 = vld [vmem:[#allocation5 + $0x54] ss:$8 sps:$4 sm:$0xff]  }
 0x62c   : > { %1671 = vmatprep.subr.bf16.mxu1 %v4157_v25  ;;  %v4180_v63 = vld [vmem:[#allocation2 + $0xc0] ss:$12 sps:$4 sm:$0xff]  }
 0x62d   : > { %1524 = vadd.xlane.f32.xlu0 %v4877_v62  ;;  %v1528_v2 = vmul.f32 %v4877_v62, %v4877_v62  ;;  %1672 = vmatpush1.bf16.msra.mxu1 %v4155_v8 }
 0x62e   : > { %1673 = vmatprep.subr.bf16.mxu1 %v4160_v9 }
 0x62f   : > { %1529 = vadd.xlane.f32.xlu1 %v1528_v2  ;;  %v4182_v2 = vld [vmem:[#allocation2 + $0xc4] ss:$12 sps:$4 sm:$0xff]  }
 0x631   : > { %1674 = vmatpush1.bf16.msra.mxu1 %v4158_v10 }
 0x632   : > { %1675 = vmatprep.subr.bf16.mxu1 %v4163_v11  ;;  %v4186_v11 = vld [vmem:[#allocation2 + $0xdc] ss:$12 sps:$4 sm:$0xff]  }
 0x635   : > { %1676 = vmatpush1.bf16.msra.mxu1 %v4161_v12  ;;  %v4184_v12 = vld [vmem:[#allocation2 + $0xd8] ss:$12 sps:$4 sm:$0xff]  }
 0x636   : > { %2091 = vmatprep.subr.bf16.mxu1 %v4182_v2 }
 0x6ba   : > { %v1525_v26 = vpop.xlane.xlu0 %1524 }
 0x6bb   : > { %v1527_v27 = vmul.f32 0.0078125, %v1525_v26  ;;  %v4203_v26 = vld [vmem:[#allocation2 + $0x140] ss:$12 sps:$4 sm:$0xff]  }
 0x6bc   : > { %v1530_v28 = vpop.xlane.xlu1 %1529 }
 0x6bd   : > { %v1533_v29 = vmul.f32 %v1527_v27, %v1527_v27  ;;  %v1531_v30 = vmul.f32 0.0078125, %v1530_v28  ;;  %v1532_v36 = vsub.f32 %v4877_v62, %v1527_v27  ;;  %v4206_v27 = vld [vmem:[#allocation2 + $0x154] ss:$12 sps:$4 sm:$0xff]   ;;  %v4204_v28 = vld [vmem:[#allocation2 + $0x150] ss:$12 sps:$4 sm:$0xff]  }
 0x6bf   : > { %v1534_v33 = vsub.f32 %v1531_v30, %v1533_v29  ;;  %v4207_v29 = vld [vmem:[#allocation2 + $0x158] ss:$12 sps:$4 sm:$0xff]  }
 0x6c0   : > { %v4210_v30 = vld [vmem:[#allocation2 + $0x16c] ss:$12 sps:$4 sm:$0xff]  }
 0x6c1   : > { %v1535_v35 = vadd.f32 1e-05, %v1534_v33  ;;  %v4208_v33 = vld [vmem:[#allocation2 + $0x168] ss:$12 sps:$4 sm:$0xff]  }
 0x6c3   : > { %4288 = vrsqrt.f32 %v1535_v35  ;;  %v4211_v35 = vld [vmem:[#allocation2 + $0x170] ss:$12 sps:$4 sm:$0xff]  }
 0x6cd   : > { %v4289_v37 = vpop.eup %4288 }
 0x6ce   : > { %v1537_v39 = vmul.f32 %v4289_v37, %v1532_v36 }
 0x6d0   : > { %v1544_v41 = vmul.f32 %v3527_v38, %v1537_v39 }
 0x6d2   : > { %v1551_v42 = vadd.f32 %v3528_v40, %v1544_v41 }
 0x6d4   : > { %v1568_v43 = vpack.c.bf16 %v1551_v42, %v1551_v42 }
 0x6d6   : > { %1694 = vmatmul.mubr.bf16.vlgmr.msra.gmra.mrb[24].mxu1 %v1568_v43 }
 0x6d7   : > { %2123 = vmatprep.mubr.bf16.mxu1 %v4479_v0  ;;  %2092 = vmatpush1.bf16.msra.mxu1 %v4180_v63 }
 0x6d8   : > { %2093 = vmatprep.subr.bf16.mxu1 %v4186_v11 }
 0x6db   : > { %2094 = vmatpush1.bf16.msra.mxu1 %v4184_v12 }
 0x6dc   : > { %2095 = vmatprep.subr.bf16.mxu1 %v4190_v14 }
 0x6df   : > { %2096 = vmatpush1.bf16.msra.mxu1 %v4188_v15 }
 0x6e0   : > { %2097 = vmatprep.subr.bf16.mxu1 %v4194_v17 }
 0x6e3   : > { %2098 = vmatpush1.bf16.msra.mxu1 %v4192_v18 }
 0x6e4   : > { %2099 = vmatprep.subr.bf16.mxu1 %v4198_v20 }
 0x6e7   : > { %2100 = vmatpush1.bf16.msra.mxu1 %v4196_v21 }
 0x6e8   : > { %2101 = vmatprep.subr.bf16.mxu1 %v4202_v23 }
 0x6eb   : > { %2102 = vmatpush1.bf16.msra.mxu1 %v4200_v24 }
 0x6ec   : > { %2103 = vmatprep.subr.bf16.mxu1 %v4206_v27 }
 0x6ef   : > { %2104 = vmatpush1.bf16.msra.mxu1 %v4204_v28 }
 0x6f0   : > { %2105 = vmatprep.subr.bf16.mxu1 %v4210_v30 }
 0x6f3   : > { %2106 = vmatpush1.bf16.msra.mxu1 %v4208_v33 }
 0x6f4   : > { %3918 = vmatprep.subr.bf16.mxu1 %v4480_v1 }
 0x7a9   : > { %v1695_v52 = vpop.f32.mrb[24].mxu1 }
 0x7aa   : > { %v1696_v53 = vadd.f32 %v1695_v52, %v1574_v49  ;;  %v1697_v54 = vpop.f32.mrb[25].mxu1  ;;  %v3564_v52 = vld [vmem:[%s5246_s21 + $0x3] sm:$0x7] }
 0x7ab   : > { %v1698_v55 = vadd.f32 %v1697_v54, %v1578_v51  ;;  %v1699_v56 = vpop.f32.mrb[26].mxu1  ;;  %v1959_v54 = vrot.slane %v3564_v52, %v717_v50 }
 0x7ac   : > { %v1702_v57 = vmax.f32 %v1696_v53, 0.0  ;;  %v1700_v58 = vpop.f32.mrb[27].mxu1  ;;  %v1951_v53 = vrot.slane %v3564_v52, %v4761_v32 }
 0x7ad   : > { %v1703_v60 = vmax.f32 %v1698_v55, 0.0  ;;  %v1955_v55 = vrot.slane %v3564_v52, %v4767_v34 }
 0x7ae   : > { %v1736_v62 = vpack.c.bf16 %v1702_v57, %v1702_v57 }
 0x7af   : > { %v1737_v61 = vpack.c.bf16 %v1703_v60, %v1703_v60 }
 0x7b1   : > { %1873 = vmatprep.mubr.bf16.mxu0 %v1737_v61 }
 0x7b2   : > { %1874 = vmatmul.mubr.bf16.vlgmr.msra.gmra.mrb[20].mxu0 %v1736_v62 }
 0x7b3   : > { %3914 = vmatprep.mubr.msk.bf16.mxu0 %vm4481_vm0, %v4480_v1  ;;  %3899 = vmatpush3.bf16.msra.mxu0 %v4183_v3 }
 0x7b4   : > { %3900 = vmatprep.subr.bf16.mxu0 %v4480_v1 }
 0x7b7   : > { %3901 = vmatpush3.bf16.msra.mxu0 %v4187_v13 }
 0x7b8   : > { %3902 = vmatprep.subr.bf16.mxu0 %v4480_v1 }
 0x7bb   : > { %3903 = vmatpush3.bf16.msra.mxu0 %v4191_v16 }
 0x7bc   : > { %3904 = vmatprep.subr.bf16.mxu0 %v4480_v1 }
 0x7bf   : > { %3905 = vmatpush3.bf16.msra.mxu0 %v4195_v19 }
 0x7c0   : > { %3906 = vmatprep.subr.bf16.mxu0 %v4480_v1 }
 0x7c3   : > { %3907 = vmatpush3.bf16.msra.mxu0 %v4199_v22 }
 0x7c4   : > { %3908 = vmatprep.subr.bf16.mxu0 %v4480_v1 }
 0x7c7   : > { %3909 = vmatpush3.bf16.msra.mxu0 %v4203_v26 }
 0x7c8   : > { %3910 = vmatprep.subr.bf16.mxu0 %v4480_v1 }
 0x7cb   : > { %3911 = vmatpush3.bf16.msra.mxu0 %v4207_v29 }
 0x7cc   : > { %3912 = vmatprep.subr.bf16.mxu0 %v4480_v1 }
 0x7cf   : > { %3913 = vmatpush3.bf16.msra.mxu0 %v4211_v35 }
 0x7d0   : > { %3942 = vmatprep.subr.bf16.mxu0 %v4480_v1 }
 0x885   : > { %v3734_v4 = vpop.f32.mrb[20].mxu0 }
 0x886   : > { %v3735_v5 = vpop.f32.mrb[21].mxu0 }
 0x887   : > { %v3736_v6 = vadd.f32 %v3735_v5, %v3734_v4  ;;  %v3737_v7 = vpop.f32.mrb[22].mxu0 }
 0x888   : > { %v3738_v25 = vpop.f32.mrb[23].mxu0 }
 0x889   : > { %v1876_v8 = vadd.f32 %v3736_v6, %v3545_v59 }
 0x88b   : > { %v4902_v9 = vadd.f32 %v1876_v8, %v1551_v42 }
 0x88d   : > { %1884 = vadd.xlane.f32.xlu0 %v4902_v9  ;;  %v1887_v10 = vmul.f32 %v4902_v9, %v4902_v9 }
 0x891   : > { %1888 = vadd.xlane.f32.xlu0 %v1887_v10 }
 0x91a   : > { %v1885_v36 = vpop.xlane.xlu0 %1884 }
 0x91b   : > { %v1886_v37 = vmul.f32 0.0078125, %v1885_v36 }
 0x91d   : > { %v1892_v39 = vmul.f32 %v1886_v37, %v1886_v37  ;;  %v1891_v43 = vsub.f32 %v4902_v9, %v1886_v37 }
 0x91e   : > { %v1889_v38 = vpop.xlane.xlu0 %1888 }
 0x91f   : > { %v1890_v40 = vmul.f32 0.0078125, %v1889_v38 }
 0x921   : > { %v1893_v41 = vsub.f32 %v1890_v40, %v1892_v39 }
 0x923   : > { %v1894_v42 = vadd.f32 1e-05, %v1893_v41 }
 0x925   : > { %4290 = vrsqrt.f32 %v1894_v42 }
 0x92f   : > { %v4291_v44 = vpop.eup %4290 }
 0x930   : > { %v1896_v46 = vmul.f32 %v4291_v44, %v1891_v43 }
 0x932   : > { %v1903_v48 = vmul.f32 %v3562_v45, %v1896_v46 }
 0x934   : > { %v4922_v49 = vadd.f32 %v3563_v47, %v1903_v48 }
 0x936   : > { %v1944_v51 = vpack.c.bf16 %v4922_v49, %v4922_v49 }
 0x938   : > { %2124 = vmatmul.mubr.bf16.vlgmr.msra.gmra.mrb[28].mxu1 %v1944_v51  ;;  %3915 = vmatmul.mubr.bf16.vlgmr.msra.gmra.mrb[24].mxu0 %v1944_v51 }
 0x939   : > { %3920 = vmatprep.mubr.msk.bf16.mxu1 %vm4481_vm0, %v4480_v1  ;;  %3944 = vmatprep.mubr.msk.bf16.mxu0 %vm4481_vm0, %v4480_v1 }
 0xa0b   : > { %v2125_v56 = vpop.f32.mrb[28].mxu1  ;;  %v2166_v57 = vpop.f32.mrb[24].mxu0 }
 0xa0c   : > { %v2126_v58 = vadd.f32 %v2125_v56, %v1951_v53  ;;  %v4937_v60 = vadd.f32 %v2166_v57, %v1959_v54  ;;  %v2127_v61 = vpop.f32.mrb[29].mxu1  ;;  %v3916_v62 = vpop.f32.mrb[25].mxu0 }
 0xa0d   : > { %v2128_v63 = vadd.f32 %v2127_v61, %v1955_v55  ;;  %v2129_v2 = vpop.f32.mrb[30].mxu1  ;;  %v2169_v3 = vpop.f32.mrb[26].mxu0 }
 0xa0e   : > { %v2130_v4 = vpop.f32.mrb[31].mxu1  ;;  %v3917_v59 = vpop.f32.mrb[27].mxu0  ;;  %2173 = vrot.lane.b32.xlu0 %v2126_v58, %s4482_s27  ;;  %v2442_v31 = vpack.c.bf16 %v4937_v60, %v4937_v60  ;;  %v2202_v7 = vpack.c.bf16 %v2126_v58, %v2126_v58 }
 0xa0f   : > { %2183 = vrot.lane.b32.xlu1 %v2128_v63, %s4482_s27  ;;  %v2206_v50 = vpack.c.bf16 %v2128_v63, %v2128_v63 }
 0xa10   : > { %v2450_v5 = vsel %vm1210_vm2, %v2442_v31, 0 }
 0xa11   : > { %3943 = vmatpush3.bf16.msra.mxu0 %v2450_v5  ;;  %v2214_v6 = vsel %vm969_vm1, %v2206_v50, 0 }
 0xa12   : > { %3919 = vmatpush3.bf16.xpose.msra.mxu1 %v2214_v6  ;;  %2189 = vrot.lane.b32.xlu0 %v2128_v63, %s4483_s17 }
 0xa13   : > { %2186 = vrot.lane.b32.xlu1 %v2128_v63, %s4484_s19  ;;  %3924 = vmatprep.subr.bf16.mxu1 %v4480_v1 }
 0xa14   : > { %3954 = vmatprep.subr.bf16.mxu0 %v4480_v1 }
 0xa17   : > { %2176 = vrot.lane.b32.xlu1 %v2126_v58, %s4484_s19 }
 0xa19   : > { %3921 = vmatmul.mubr.msk.bf16.vlgmr.msra.gmra.mrb[32].mxu1 %vm969_vm1, %v2202_v7 }
 0xa1a   : > { %3926 = vmatprep.mubr.msk.bf16.mxu1 %vm4481_vm0, %v4480_v1 }
 0xa1b   : > { %2179 = vrot.lane.b32.xlu1 %v2126_v58, %s4483_s17 }
 0xa80   : > { %v2174_v11 = vpop.permute.xlu0 %2173 }
 0xa81   : > { %v2184_v25 = vpop.permute.xlu1 %2183  ;;  %v2203_v13 = vpack.c.bf16 %v2174_v11, %v2174_v11 }
 0xa82   : > { %v2207_v8 = vpack.c.bf16 %v2184_v25, %v2184_v25 }
 0xa84   : > { %v2260_v9 = vsel %vm969_vm1, %v2207_v8, 0  ;;  %v2190_v15 = vpop.permute.xlu0 %2189 }
 0xa85   : > { %v2187_v10 = vpop.permute.xlu1 %2186  ;;  %3925 = vmatpush3.bf16.xpose.msra.mxu1 %v2260_v9  ;;  %v2209_v17 = vpack.c.bf16 %v2190_v15, %v2190_v15 }
 0xa86   : > { %3930 = vmatprep.subr.bf16.mxu1 %v4480_v1  ;;  %v2208_v12 = vpack.c.bf16 %v2187_v10, %v2187_v10 }
 0xa87   : > { %v2352_v19 = vsel %vm969_vm1, %v2209_v17, 0 }
 0xa88   : > { %v2306_v14 = vsel %vm969_vm1, %v2208_v12, 0 }
 0xa89   : > { %v2177_v16 = vpop.permute.xlu1 %2176 }
 0xa8a   : > { %v2204_v18 = vpack.c.bf16 %v2177_v16, %v2177_v16 }
 0xa8c   : > { %3927 = vmatmul.mubr.msk.bf16.vlgmr.msra.gmra.mrb[36].mxu1 %vm969_vm1, %v2203_v13 }
 0xa8d   : > { %3931 = vmatpush3.bf16.xpose.msra.mxu1 %v2306_v14  ;;  %3932 = vmatprep.mubr.msk.bf16.mxu1 %vm4481_vm0, %v4480_v1  ;;  %v2180_v20 = vpop.permute.xlu1 %2179 }
 0xa8e   : > { %3936 = vmatprep.subr.bf16.mxu1 %v4480_v1  ;;  %v2205_v21 = vpack.c.bf16 %v2180_v20, %v2180_v20 }
 0xa94   : > { %3933 = vmatmul.mubr.msk.bf16.vlgmr.msra.gmra.mrb[40].mxu1 %vm969_vm1, %v2204_v18 }
 0xa95   : > { %3937 = vmatpush3.bf16.xpose.msra.mxu1 %v2352_v19  ;;  %3938 = vmatprep.mubr.msk.bf16.mxu1 %vm4481_vm0, %v4480_v1 }
 0xa96   : > { %3948 = vmatprep.subr.bf16.mxu1 %v4480_v1 }
 0xa9c   : > { %3939 = vmatmul.mubr.msk.bf16.vlgmr.msra.gmra.mrb[44].mxu1 %vm969_vm1, %v2205_v21 }
 0xa9d   : > { %3950 = vmatprep.mubr.msk.bf16.mxu1 %vm4481_vm0, %v4480_v1 }
 0xaec   : > { %v2250_v22 = vpop.f32.mrb[32].mxu1 }
 0xaed   : > { %v3922_v23 = vpop.f32.mrb[33].mxu1  ;;  %v2394_v24 = vsel %vm1154_vm3, %v2250_v22, -inf }
 0xaee   : > { %2395 = vmax.xlane.f32.xlu0 %v2394_v24  ;;  %v2253_v26 = vpop.f32.mrb[34].mxu1 }
 0xaef   : > { %v3923_v27 = vpop.f32.mrb[35].mxu1 }
 0xb5f   : > { %v2296_v28 = vpop.f32.mrb[36].mxu1 }
 0xb60   : > { %v3928_v29 = vpop.f32.mrb[37].mxu1  ;;  %v2397_v30 = vsel %vm1154_vm3, %v2296_v28, -inf }
 0xb61   : > { %2398 = vmax.xlane.f32.xlu1 %v2397_v30  ;;  %v2299_v33 = vpop.f32.mrb[38].mxu1  ;;  %v4212_v29 = vld [vmem:[%s5247_s30 + $0x40] sm:$0xff]   ;;  %v4213_v30 = vld [vmem:[%s5247_s30 + $0x48] sm:$0xff]  }
 0xb62   : > { %v3929_v35 = vpop.f32.mrb[39].mxu1 }
 0xb67   : > { %v2342_v36 = vpop.f32.mrb[40].mxu1 }
 0xb68   : > { %v3934_v37 = vpop.f32.mrb[41].mxu1  ;;  %v2400_v38 = vsel %vm1154_vm3, %v2342_v36, -inf }
 0xb69   : > { %2401 = vmax.xlane.f32.xlu0 %v2400_v38  ;;  %v2345_v39 = vpop.f32.mrb[42].mxu1  ;;  %v4214_v37 = vld [vmem:[%s5247_s30 + $0x50] sm:$0xff]   ;;  %v4215_v38 = vld [vmem:[%s5247_s30 + $0x58] sm:$0xff]  }
 0xb6a   : > { %v3935_v40 = vpop.f32.mrb[43].mxu1  ;;  %v4216_v39 = vld [vmem:[%s5247_s30 + $0x60] sm:$0xff]  }
 0xb6b   : > { %v4217_v40 = vld [vmem:[%s5247_s30 + $0x68] sm:$0xff]  }
 0xb6f   : > { %v2388_v41 = vpop.f32.mrb[44].mxu1 }
 0xb70   : > { %v3940_v42 = vpop.f32.mrb[45].mxu1  ;;  %v2403_v43 = vsel %vm1154_vm3, %v2388_v41, -inf }
 0xb71   : > { %2404 = vmax.xlane.f32.xlu0 %v2403_v43  ;;  %v2391_v44 = vpop.f32.mrb[46].mxu1 }
 0xb72   : > { %2193 = vrot.lane.b32.xlu1 %v4937_v60, %s4482_s27  ;;  %v3941_v45 = vpop.f32.mrb[47].mxu1 }
 0xb7b   : > { %v2396_v46 = vpop.xlane.xlu0 %2395 }
 0xb7c   : > { %v2406_v47 = vsub.f32 %v2250_v22, %v2396_v46  ;;  %v4219_v46 = vld [vmem:[%s5247_s30 + $0x78] sm:$0xff]  }
 0xb7e   : > { %v2410_v48 = vmul.f32 1.442695, %v2406_v47 }
 0xb80   : > { %4292 = vpow2.f32 %v2410_v48 }
 0xb8a   : > { %v4293_v51 = vpop.eup %4292 }
 0xb8b   : > { %v2418_v52 = vsel %vm1154_vm3, %v4293_v51, 0.0 }
 0xb96   : > { %2419 = vadd.xlane.f32.xlu1 %v2418_v52 }
 0xbee   : > { %v2399_v53 = vpop.xlane.xlu1 %2398 }
 0xbef   : > { %v2407_v54 = vsub.f32 %v2296_v28, %v2399_v53 }
 0xbf1   : > { %v2412_v55 = vmul.f32 1.442695, %v2407_v54 }
 0xbf2   : > { %v2194_v56 = vpop.permute.xlu1 %2193 }
 0xbf3   : > { %4294 = vpow2.f32 %v2412_v55  ;;  %v2443_v57 = vpack.c.bf16 %v2194_v56, %v2194_v56 }
 0xbf5   : > { %v2496_v58 = vsel %vm1210_vm2, %v2443_v57, 0 }
 0xbf6   : > { %3949 = vmatpush3.bf16.msra.mxu1 %v2496_v58  ;;  %v2402_v61 = vpop.xlane.xlu0 %2401 }
 0xbf7   : > { %v2408_v62 = vsub.f32 %v2342_v36, %v2402_v61  ;;  %3960 = vmatprep.subr.bf16.mxu1 %v4480_v1 }
 0xbf9   : > { %v2414_v63 = vmul.f32 1.442695, %v2408_v62 }
 0xbfb   : > { %4296 = vpow2.f32 %v2414_v63 }
 0xbfd   : > { %v4295_v2 = vpop.eup %4294 }
 0xbfe   : > { %v2405_v3 = vpop.xlane.xlu0 %2404  ;;  %v2421_v4 = vsel %vm1154_vm3, %v4295_v2, 0.0 }
 0xbff   : > { %v2409_v59 = vsub.f32 %v2388_v41, %v2405_v3  ;;  %2422 = vadd.xlane.f32.xlu0 %v2421_v4  ;;  %v4218_v41 = vld [vmem:[%s5247_s30 + $0x70] sm:$0xff]   ;;  %v4220_v4 = vld [vmem:[#allocation5 + $0x80] ss:$8 sps:$4 sm:$0xff]  }
 0xc01   : > { %v2416_v31 = vmul.f32 1.442695, %v2409_v59  ;;  %v4222_v59 = vld [vmem:[#allocation5 + $0x84] ss:$8 sps:$4 sm:$0xff]  }
 0xc03   : > { %4298 = vpow2.f32 %v2416_v31  ;;  %v4225_v31 = vld [vmem:[#allocation5 + $0x94] ss:$8 sps:$4 sm:$0xff]  }
 0xc05   : > { %v4297_v50 = vpop.eup %4296 }
 0xc06   : > { %v2424_v5 = vsel %vm1154_vm3, %v4297_v50, 0.0 }
 0xc07   : > { %2425 = vadd.xlane.f32.xlu1 %v2424_v5  ;;  %v3614_v5 = vld [vmem:[%s5183_s5 + $0x1] ss:$0 sm:$0xff] }
 0xc0d   : > { %v4299_v6 = vpop.eup %4298 }
 0xc0e   : > { %v2427_v7 = vsel %vm1154_vm3, %v4299_v6, 0.0 }
 0xc0f   : > { %2428 = vadd.xlane.f32.xlu0 %v2427_v7 }
 0xc18   : > { %2199 = vrot.lane.b32.xlu1 %v4937_v60, %s4483_s17 }
 0xc23   : > { %v2420_v25 = vpop.xlane.xlu1 %2419 }
 0xc24   : > { %4300 = vrcp.f32 %v2420_v25 }
 0xc25   : > { %2196 = vrot.lane.b32.xlu0 %v4937_v60, %s4484_s19 }
 0xc2e   : > { %v4301_v8 = vpop.eup %4300 }
 0xc2f   : > { %v2434_v9 = vmul.f32 %v4301_v8, %v4293_v51 }
 0xc31   : > { %v2438_v10 = vpack.c.bf16 %v2434_v9, %v2434_v9 }
 0xc33   : > { %3945 = vmatmul.mubr.msk.bf16.vlgmr.msra.gmra.mrb[28].mxu0 %vm1154_vm3, %v2438_v10 }
 0xc34   : > { %3956 = vmatprep.mubr.msk.bf16.mxu0 %vm4481_vm0, %v4480_v1 }
 0xc8c   : > { %v2423_v11 = vpop.xlane.xlu0 %2422 }
 0xc8d   : > { %4302 = vrcp.f32 %v2423_v11 }
 0xc94   : > { %v2426_v12 = vpop.xlane.xlu1 %2425 }
 0xc95   : > { %4304 = vrcp.f32 %v2426_v12  ;;  %v4228_v12 = vld [vmem:[#allocation5 + $0xa4] ss:$8 sps:$4 sm:$0xff]  }
 0xc97   : > { %v4303_v13 = vpop.eup %4302 }
 0xc98   : > { %v2435_v14 = vmul.f32 %v4303_v13, %v4295_v2  ;;  %v2200_v15 = vpop.permute.xlu1 %2199  ;;  %v4226_v13 = vld [vmem:[#allocation5 + $0xa0] ss:$8 sps:$4 sm:$0xff]  }
 0xc99   : > { %v2445_v16 = vpack.c.bf16 %v2200_v15, %v2200_v15  ;;  %v4229_v15 = vld [vmem:[#allocation5 + $0xb0] ss:$8 sps:$4 sm:$0xff]  }
 0xc9a   : > { %v2439_v17 = vpack.c.bf16 %v2435_v14, %v2435_v14  ;;  %v4231_v14 = vld [vmem:[#allocation5 + $0xb4] ss:$8 sps:$4 sm:$0xff]  }
 0xc9b   : > { %v2588_v18 = vsel %vm1210_vm2, %v2445_v16, 0  ;;  %v4234_v16 = vld [vmem:[#allocation5 + $0xc4] ss:$8 sps:$4 sm:$0xff]  }
 0xc9c   : > { %3951 = vmatmul.mubr.msk.bf16.vlgmr.msra.gmra.mrb[48].mxu1 %vm1154_vm3, %v2439_v17  ;;  %v2429_v60 = vpop.xlane.xlu0 %2428  ;;  %v4232_v17 = vld [vmem:[#allocation5 + $0xc0] ss:$8 sps:$4 sm:$0xff]  }
 0xc9d   : > { %3961 = vmatpush3.bf16.msra.mxu1 %v2588_v18  ;;  %4306 = vrcp.f32 %v2429_v60  ;;  %3962 = vmatprep.mubr.msk.bf16.mxu1 %vm4481_vm0, %v4480_v1  ;;  %v4235_v18 = vld [vmem:[#allocation5 + $0xd0] ss:$8 sps:$4 sm:$0xff]   ;;  %v4240_v60 = vld [vmem:[#allocation5 + $0xe4] ss:$8 sps:$4 sm:$0xff]  }
 0xc9e   : > { %2902 = vmatprep.subr.bf16.mxu1 %v4222_v59 }
 0xc9f   : > { %v4305_v19 = vpop.eup %4304 }
 0xca0   : > { %v2197_v20 = vpop.permute.xlu0 %2196  ;;  %v2436_v21 = vmul.f32 %v4305_v19, %v4297_v50  ;;  %v4223_v50 = vld [vmem:[#allocation5 + $0x90] ss:$8 sps:$4 sm:$0xff]   ;;  %v4238_v19 = vld [vmem:[#allocation5 + $0xe0] ss:$8 sps:$4 sm:$0xff]  }
 0xca1   : > { %v2444_v22 = vpack.c.bf16 %v2197_v20, %v2197_v20  ;;  %v4243_v20 = vld [vmem:[#allocation5 + $0xf4] ss:$8 sps:$4 sm:$0xff]  }
 0xca2   : > { %v2440_v24 = vpack.c.bf16 %v2436_v21, %v2436_v21  ;;  %v4241_v21 = vld [vmem:[#allocation5 + $0xf0] ss:$8 sps:$4 sm:$0xff]  }
 0xca3   : > { %v2542_v23 = vsel %vm1210_vm2, %v2444_v22, 0  ;;  %v4244_v22 = vld [vmem:[#allocation7 + $0xc0] sm:$0xff]  }
 0xca4   : > { %3955 = vmatpush3.bf16.msra.mxu0 %v2542_v23  ;;  %v4245_v23 = vld [vmem:[#allocation7 + $0x80] sm:$0xff]  }
 0xca5   : > { %3966 = vmatprep.subr.bf16.mxu0 %v4480_v1 }
 0xca7   : > { %v4307_v26 = vpop.eup %4306  ;;  %3957 = vmatmul.mubr.msk.bf16.vlgmr.msra.gmra.mrb[32].mxu0 %vm1154_vm3, %v2440_v24  ;;  %v4246_v24 = vld [vmem:[#allocation7 + $0xc8] sm:$0xff]  }
 0xca8   : > { %v2437_v27 = vmul.f32 %v4307_v26, %v4299_v6  ;;  %3982 = vmatprep.mubr.msk.bf16.mxu0 %vm4481_vm0, %v4480_v1  ;;  %3967 = vmatpush3.bf16.msra.mxu0 %v4212_v29  ;;  %v4247_v26 = vld [vmem:[#allocation7 + $0x88] sm:$0xff]   ;;  %v4250_v29 = vld [vmem:[#allocation7 + $0xd8] sm:$0xff]  }
 0xca9   : > { %3968 = vmatprep.subr.bf16.mxu0 %v4480_v1 }
 0xcaa   : > { %v2441_v28 = vpack.c.bf16 %v2437_v27, %v2437_v27  ;;  %v4248_v27 = vld [vmem:[#allocation7 + $0xd0] sm:$0xff]  }
 0xcac   : > { %3963 = vmatmul.mubr.msk.bf16.vlgmr.msra.gmra.mrb[52].mxu1 %vm1154_vm3, %v2441_v28  ;;  %3969 = vmatpush3.bf16.msra.mxu0 %v4213_v30  ;;  %v4249_v28 = vld [vmem:[#allocation7 + $0x90] sm:$0xff]   ;;  %v4251_v30 = vld [vmem:[#allocation7 + $0x98] sm:$0xff]  }
 0xcad   : > { %2934 = vmatprep.mubr.bf16.mxu1 %v4479_v0  ;;  %3970 = vmatprep.subr.bf16.mxu0 %v4480_v1 }
 0xcae   : > { %2903 = vmatpush1.bf16.msra.mxu1 %v4220_v4 }
 0xcaf   : > { %2904 = vmatprep.subr.bf16.mxu1 %v4225_v31 }
 0xcb0   : > { %3971 = vmatpush3.bf16.msra.mxu0 %v4214_v37  ;;  %v4255_v37 = vld [vmem:[#allocation7 + $0xa8] sm:$0xff]  }
 0xcb1   : > { %3972 = vmatprep.subr.bf16.mxu0 %v4480_v1 }
 0xcb2   : > { %2905 = vmatpush1.bf16.msra.mxu1 %v4223_v50 }
 0xcb3   : > { %2906 = vmatprep.subr.bf16.mxu1 %v4228_v12 }
 0xcb4   : > { %3973 = vmatpush3.bf16.msra.mxu0 %v4215_v38 }
 0xcb5   : > { %3974 = vmatprep.subr.bf16.mxu0 %v4480_v1 }
 0xcb6   : > { %2907 = vmatpush1.bf16.msra.mxu1 %v4226_v13 }
 0xcb7   : > { %2908 = vmatprep.subr.bf16.mxu1 %v4231_v14 }
 0xcb8   : > { %3975 = vmatpush3.bf16.msra.mxu0 %v4216_v39 }
 0xcb9   : > { %3976 = vmatprep.subr.bf16.mxu0 %v4480_v1 }
 0xcba   : > { %2909 = vmatpush1.bf16.msra.mxu1 %v4229_v15 }
 0xcbb   : > { %2910 = vmatprep.subr.bf16.mxu1 %v4234_v16 }
 0xcbc   : > { %3977 = vmatpush3.bf16.msra.mxu0 %v4217_v40 }
 0xcbd   : > { %3978 = vmatprep.subr.bf16.mxu0 %v4480_v1 }
 0xcbe   : > { %2911 = vmatpush1.bf16.msra.mxu1 %v4232_v17 }
 0xcc0   : > { %3979 = vmatpush3.bf16.msra.mxu0 %v4218_v41 }
 0xcc1   : > { %3980 = vmatprep.subr.bf16.mxu0 %v4480_v1 }
 0xcc4   : > { %3981 = vmatpush3.bf16.msra.mxu0 %v4219_v46  ;;  %v3625_v46 = vld [vmem:[%s5184_s6 + $0x1] ss:$0 sm:$0xff] }
 0xcc5   : > { %3774 = vmatprep.subr.bf16.mxu0 %v4244_v22 }
 0xd06   : > { %v2486_v33 = vpop.f32.mrb[28].mxu0 }
 0xd07   : > { %v3946_v35 = vpop.f32.mrb[29].mxu0 }
 0xd08   : > { %v2489_v36 = vpop.f32.mrb[30].mxu0  ;;  %v4253_v35 = vld [vmem:[#allocation7 + $0xa0] sm:$0xff]  }
 0xd09   : > { %v3947_v0 = vpop.f32.mrb[31].mxu0  ;;  %v4254_v36 = vld [vmem:[#allocation7 + $0xe8] sm:$0xff]  }
 0xd6f   : > { %v2532_v42 = vpop.f32.mrb[48].mxu1 }
 0xd70   : > { %2631 = vrot.lane.b32.xlu1 %v2532_v42, %s4483_s17  ;;  %v3952_v43 = vpop.f32.mrb[49].mxu1  ;;  %s662_s17 = sand.u32 1, %s5248_s24  }
 0xd71   : > { %v2535_v44 = vpop.f32.mrb[50].mxu1  ;;  %s663_s4 = scalar_lea.vmem [#allocation8], %s662_s17  ;;  %s3377_s2 = scalar_lea.sflag [#allocation4], %s662_s17 }
 0xd72   : > { %v3953_v45 = vpop.f32.mrb[51].mxu1  ;;  %s3389_s1 = sshll.u32 %s663_s4, 4  ;;  %s5138_s1 = int_to_ptr.vmem [resolvable:$true] %s3389_s1 }
 0xd73   : > { %s4398_s24 = scalar_lea.vmem %s5138_s1, 16 }
 0xd74   : > { %p4399_p10 = scmp.ne.s32.totalorder %s5138_s1, %s4398_s24 }
 0xd76   : > { %p4400_p2 = pnand %p4399_p10, %p5253_p1 }
 0xd78   : > { %p4401_p3 = pneg %p4400_p2 }
 0xd7a   : > { %v2578_v47 = vpop.f32.mrb[32].mxu0 }
 0xd7b   : > { %2635 = vrot.lane.b32.xlu0 %v2578_v47, %s4484_s19  ;;  %v3958_v48 = vpop.f32.mrb[33].mxu0 }
 0xd7c   : > { %v2581_v51 = vpop.f32.mrb[34].mxu0  ;;  %v3626_v48 = vld [vmem:[%s5185_s7 + $0x1] ss:$0 sm:$0xff] }
 0xd7d   : > { %v3959_v52 = vpop.f32.mrb[35].mxu0 }
 0xd7f   : > { %v2624_v53 = vpop.f32.mrb[52].mxu1 }
 0xd80   : > { %2639 = vrot.lane.b32.xlu1 %v2624_v53, %s4482_s27  ;;  %v3964_v54 = vpop.f32.mrb[53].mxu1  ;;  %s5249_s27 = sld [smem:[#allocation26_spill]] }
 0xd81   : > { %v2627_v55 = vpop.f32.mrb[54].mxu1  ;;  %v4256_v54 = vld [vmem:[#allocation7 + $0xf0] sm:$0xff]  }
 0xd82   : > { %v3965_v56 = vpop.f32.mrb[55].mxu1  ;;  %v4257_v55 = vld [vmem:[#allocation7 + $0xb0] sm:$0xff]  }
 0xd83   : > { %v4258_v56 = vld [vmem:[#allocation7 + $0xf8] sm:$0xff]  }
 0xde2   : > { %v2632_v57 = vpop.permute.xlu1 %2631 }
 0xde3   : > { %v2642_v61 = vsel %vm969_vm1, %v2486_v33, %v2632_v57  ;;  %v4252_v33 = vld [vmem:[#allocation7 + $0xe0] sm:$0xff]   ;;  %v4259_v57 = vld [vmem:[#allocation7 + $0xb8] sm:$0xff]  }
 0xded   : > { %v2636_v58 = vpop.permute.xlu0 %2635 }
 0xdee   : > { %v2643_v62 = vsel %vm1405_vm4, %v2642_v61, %v2636_v58  ;;  %v3627_v58 = vld [vmem:[%s5187_s9 + $0x2] sm:$0x3] }
 0xdef   : > { %v2815_v61 = vrot.slane %v3627_v58, %v4761_v32  ;;  %v3645_v32 = vld [vmem:[%s5189_s11 + $0x1] ss:$0 sm:$0xff] }
 0xdf2   : > { %v2640_v63 = vpop.permute.xlu1 %2639 }
 0xdf3   : > { %v2644_v2 = vsel %vm1407_vm5, %v2643_v62, %v2640_v63  ;;  %v2819_v62 = vrot.slane %v3627_v58, %v4767_v34 }
 0xdf4   : > { %v2662_v3 = vpack.c.bf16 %v2644_v2, %v2644_v2 }
 0xdf6   : > { %3983 = vmatmul.mubr.bf16.vlgmr.msra.gmra.mrb[36].mxu0 %v2662_v3 }
 0xdf7   : > { %3775 = vmatpush3.bf16.msra.mxu0 %v4245_v23  ;;  %v3665_v23 = vld [vmem:[%s5191_s13 + $0x1] ss:$0 sm:$0xff] }
 0xdf8   : > { %3776 = vmatprep.subr.bf16.mxu0 %v4246_v24 }
 0xdfb   : > { %3777 = vmatpush3.bf16.msra.mxu0 %v4247_v26 }
 0xdfc   : > { %3778 = vmatprep.subr.bf16.mxu0 %v4248_v27 }
 0xdff   : > { %3779 = vmatpush3.bf16.msra.mxu0 %v4249_v28  ;;  %v4260_v28 = vld [vmem:[%s5194_s16] sm:$0xff]  }
 0xe00   : > { %3780 = vmatprep.subr.bf16.mxu0 %v4250_v29  ;;  %v4261_v29 = vld [vmem:[%s5194_s16 + $0x8] sm:$0xff]  }
 0xe03   : > { %3781 = vmatpush3.bf16.msra.mxu0 %v4251_v30  ;;  %v4262_v30 = vld [vmem:[%s5194_s16 + $0x10] sm:$0xff]  }
 0xe04   : > { %3782 = vmatprep.subr.bf16.mxu0 %v4252_v33  ;;  %v4263_v33 = vld [vmem:[%s5194_s16 + $0x18] sm:$0xff]  }
 0xe07   : > { %3783 = vmatpush3.bf16.msra.mxu0 %v4253_v35  ;;  %v4264_v35 = vld [vmem:[%s5194_s16 + $0x20] sm:$0xff]  }
 0xe08   : > { %3784 = vmatprep.subr.bf16.mxu0 %v4254_v36  ;;  %v4265_v36 = vld [vmem:[%s5194_s16 + $0x28] sm:$0xff]  }
 0xe0b   : > { %3785 = vmatpush3.bf16.msra.mxu0 %v4255_v37  ;;  %v4266_v37 = vld [vmem:[%s5194_s16 + $0x30] sm:$0xff]  }
 0xe0c   : > { %3786 = vmatprep.subr.bf16.mxu0 %v4256_v54  ;;  %v3667_v54 = vld [vmem:[%s5193_s15] ss:$0 sm:$0xff] }
 0xe0f   : > { %3787 = vmatpush3.bf16.msra.mxu0 %v4257_v55 }
 0xe10   : > { %3788 = vmatprep.subr.bf16.mxu0 %v4258_v56 }
 0xe13   : > { %3789 = vmatpush3.bf16.msra.mxu0 %v4259_v57 }
 0xe14   : > { %4006 = vmatprep.subr.bf16.mxu0 %v4480_v1 }
 0xec9   : > { %v2753_v6 = vpop.f32.mrb[36].mxu0 }
 0xeca   : > { %v2754_v7 = vadd.f32 %v3614_v5, %v2753_v6  ;;  %v3984_v25 = vpop.f32.mrb[37].mxu0 }
 0xecb   : > { %v2756_v8 = vpop.f32.mrb[38].mxu0 }
 0xecc   : > { %v5040_v9 = vadd.f32 %v2754_v7, %v4922_v49  ;;  %v3985_v10 = vpop.f32.mrb[39].mxu0  ;;  %v4237_v49 = vld [vmem:[#allocation5 + $0xd4] ss:$8 sps:$4 sm:$0xff]  }
 0xecd   : > { %2912 = vmatprep.subr.bf16.mxu1 %v4237_v49 }
 0xece   : > { %2764 = vadd.xlane.f32.xlu0 %v5040_v9  ;;  %v2767_v11 = vmul.f32 %v5040_v9, %v5040_v9  ;;  %2913 = vmatpush1.bf16.msra.mxu1 %v4235_v18 }
 0xecf   : > { %2914 = vmatprep.subr.bf16.mxu1 %v4240_v60 }
 0xed0   : > { %2768 = vadd.xlane.f32.xlu1 %v2767_v11 }
 0xed2   : > { %2915 = vmatpush1.bf16.msra.mxu1 %v4238_v19 }
 0xed3   : > { %2916 = vmatprep.subr.bf16.mxu1 %v4243_v20 }
 0xed6   : > { %2917 = vmatpush1.bf16.msra.mxu1 %v4241_v21  ;;  %v3664_v21 = vld [vmem:[%s5190_s12 + $0x1] ss:$0 sm:$0xff] }
 0xed7   : > { %3986 = vmatprep.subr.bf16.mxu1 %v4480_v1 }
 0xf5b   : > { %v2765_v0 = vpop.xlane.xlu0 %2764 }
 0xf5c   : > { %v2766_v38 = vmul.f32 0.0078125, %v2765_v0  ;;  %v4267_v0 = vld [vmem:[%s5194_s16 + $0x38] sm:$0xff]  }
 0xf5d   : > { %v2769_v39 = vpop.xlane.xlu1 %2768 }
 0xf5e   : > { %v2772_v40 = vmul.f32 %v2766_v38, %v2766_v38  ;;  %v2770_v41 = vmul.f32 0.0078125, %v2769_v39  ;;  %v2771_v44 = vsub.f32 %v5040_v9, %v2766_v38  ;;  %v4268_v38 = vld [vmem:[%s5196_s18] sm:$0xff]   ;;  %v4269_v39 = vld [vmem:[%s5196_s18 + $0x8] sm:$0xff]  }
 0xf60   : > { %v2773_v42 = vsub.f32 %v2770_v41, %v2772_v40  ;;  %v4270_v40 = vld [vmem:[%s5196_s18 + $0x10] sm:$0xff]  }
 0xf62   : > { %v2774_v43 = vadd.f32 1e-05, %v2773_v42 }
 0xf64   : > { %4308 = vrsqrt.f32 %v2774_v43 }
 0xf6e   : > { %v4309_v45 = vpop.eup %4308 }
 0xf6f   : > { %v2776_v47 = vmul.f32 %v4309_v45, %v2771_v44 }
 0xf71   : > { %v2783_v51 = vmul.f32 %v3625_v46, %v2776_v47 }
 0xf73   : > { %v2790_v52 = vadd.f32 %v3626_v48, %v2783_v51 }
 0xf75   : > { %v2808_v53 = vpack.c.bf16 %v2790_v52, %v2790_v52 }
 0xf77   : > { %2935 = vmatmul.mubr.bf16.vlgmr.msra.gmra.mrb[56].mxu1 %v2808_v53 }
 0xf78   : > { %4002 = vmatprep.mubr.msk.bf16.mxu1 %vm4481_vm0, %v4480_v1  ;;  %3987 = vmatpush3.bf16.msra.mxu1 %v4260_v28 }
 0xf79   : > { %3988 = vmatprep.subr.bf16.mxu1 %v4480_v1 }
 0xf7c   : > { %3989 = vmatpush3.bf16.msra.mxu1 %v4261_v29 }
 0xf7d   : > { %3990 = vmatprep.subr.bf16.mxu1 %v4480_v1 }
 0xf80   : > { %3991 = vmatpush3.bf16.msra.mxu1 %v4262_v30 }
 0xf81   : > { %3992 = vmatprep.subr.bf16.mxu1 %v4480_v1 }
 0xf84   : > { %3993 = vmatpush3.bf16.msra.mxu1 %v4263_v33 }
 0xf85   : > { %3994 = vmatprep.subr.bf16.mxu1 %v4480_v1 }
 0xf88   : > { %3995 = vmatpush3.bf16.msra.mxu1 %v4264_v35 }
 0xf89   : > { %3996 = vmatprep.subr.bf16.mxu1 %v4480_v1 }
 0xf8c   : > { %3997 = vmatpush3.bf16.msra.mxu1 %v4265_v36 }
 0xf8d   : > { %3998 = vmatprep.subr.bf16.mxu1 %v4480_v1 }
 0xf90   : > { %3999 = vmatpush3.bf16.msra.mxu1 %v4266_v37 }
 0xf91   : > { %4000 = vmatprep.subr.bf16.mxu1 %v4480_v1 }
 0xf94   : > { %4001 = vmatpush3.bf16.msra.mxu1 %v4267_v0 }
0x104a   : > { %v2936_v63 = vpop.f32.mrb[56].mxu1 }
0x104b   : > { %v2937_v2 = vadd.f32 %v2936_v63, %v2815_v61  ;;  %v2938_v3 = vpop.f32.mrb[57].mxu1 }
0x104c   : > { %v2939_v4 = vadd.f32 %v2938_v3, %v2819_v62  ;;  %v2940_v59 = vpop.f32.mrb[58].mxu1  ;;  %v4271_v3 = vld [vmem:[%s5196_s18 + $0x18] sm:$0xff]  }
0x104d   : > { %v2943_v31 = vmax.f32 %v2937_v2, 0.0  ;;  %v2941_v50 = vpop.f32.mrb[59].mxu1 }
0x104e   : > { %v2944_v5 = vmax.f32 %v2939_v4, 0.0  ;;  %v3208_v4 = vld [vmem:[%s5249_s27] sm:$0x1]  ;;  %s4402_s27 = sshll.u32 %s4485_s23, 4  ;;  %s4403_s27 = int_to_ptr.vmem [resolvable:$false] %s4402_s27 }
0x104f   : > { %v2978_v7 = vpack.c.bf16 %v2943_v31, %v2943_v31  ;;  %s4404_s19 = scalar_lea.vmem %s4403_s27, 32  ;;  %p4405_p4 = scmp.lt.s32.totalorder %s5138_s1, %s4403_s27 }
0x1050   : > { %v2979_v6 = vpack.c.bf16 %v2944_v5, %v2944_v5  ;;  %p4406_p7 = scmp.lt.s32.totalorder %s4404_s19, %s4398_s24 }
0x1052   : > { %3116 = vmatprep.mubr.bf16.mxu0 %v2979_v6  ;;  %p4407_p8 = por %p4406_p7, %p4405_p4 }
0x1053   : > { %3117 = vmatmul.mubr.bf16.vlgmr.msra.gmra.mrb[40].mxu0 %v2978_v7 }
0x1054   : > { %4014 = vmatprep.mubr.msk.bf16.mxu0 %vm4481_vm0, %v4480_v1  ;;  %4007 = vmatpush3.bf16.msra.mxu0 %v4268_v38  ;;  %p4408_p11 = pnand %p4407_p8, %p4401_p3 }
0x1055   : > { %4008 = vmatprep.subr.bf16.mxu0 %v4480_v1 }
0x1058   : > { %4009 = vmatpush3.bf16.msra.mxu0 %v4269_v39 }
0x1059   : > { %4010 = vmatprep.subr.bf16.mxu0 %v4480_v1 }
0x105c   : > { %4011 = vmatpush3.bf16.msra.mxu0 %v4270_v40 }
0x105d   : > { %4012 = vmatprep.subr.bf16.mxu0 %v4480_v1 }
0x1060   : > { %4013 = vmatpush3.bf16.msra.mxu0 %v4271_v3 }
0x1126   : > { %v3790_v25 = vpop.f32.mrb[40].mxu0 }
0x1127   : > { %v3791_v34 = vpop.f32.mrb[41].mxu0 }
0x1128   : > { %v3792_v8 = vadd.f32 %v3791_v34, %v3790_v25  ;;  %v3793_v9 = vpop.f32.mrb[42].mxu0  ;;  %v3306_v25 = vld [vmem:[%s5250_s8] sm:$0x1] }
0x1129   : > { %v3794_v10 = vpop.f32.mrb[43].mxu0 }
0x112a   : > { %v3119_v11 = vadd.f32 %v3792_v8, %v3645_v32 }
0x112c   : > { %v3124_v12 = vadd.f32 %v3119_v11, %v2790_v52  ;;  %v3666_v52 = vld [vmem:[%s5192_s14] ss:$0 sm:$0xff] }
0x112e   : > { %3129 = vadd.xlane.f32.xlu0 %v3124_v12  ;;  %v3132_v13 = vmul.f32 %v3124_v12, %v3124_v12 }
0x1132   : > { %3133 = vadd.xlane.f32.xlu0 %v3132_v13 }
0x11bb   : > { %v3130_v14 = vpop.xlane.xlu0 %3129 }
0x11bc   : > { %v3131_v15 = vmul.f32 0.0078125, %v3130_v14 }
0x11be   : > { %v3137_v17 = vmul.f32 %v3131_v15, %v3131_v15  ;;  %v3136_v19 = vsub.f32 %v3124_v12, %v3131_v15 }
0x11bf   : > { %v3134_v16 = vpop.xlane.xlu0 %3133 }
0x11c0   : > { %v3135_v49 = vmul.f32 0.0078125, %v3134_v16 }
0x11c2   : > { %v3138_v18 = vsub.f32 %v3135_v49, %v3137_v17 }
0x11c4   : > { %v3139_v60 = vadd.f32 1e-05, %v3138_v18 }
0x11c6   : > { %4310 = vrsqrt.f32 %v3139_v60 }
0x11d0   : > { %v4311_v20 = vpop.eup %4310 }
0x11d1   : > { %v3141_v22 = vmul.f32 %v4311_v20, %v3136_v19 }
0x11d3   : > { %v3148_v24 = vmul.f32 %v3664_v21, %v3141_v22 }
0x11d5   : > { %v3155_v26 = vadd.f32 %v3665_v23, %v3148_v24 }
0x11d7   : > { %3158 = vadd.xlane.f32.xlu1 %v3155_v26  ;;  %v3161_v27 = vmul.f32 %v3155_v26, %v3155_v26 }
0x11d9   : > { %3162 = vadd.xlane.f32.xlu0 %v3161_v27 }
0x1264   : > { %v3159_v41 = vpop.xlane.xlu1 %3158 }
0x1265   : > { %v3160_v42 = vmul.f32 0.0078125, %v3159_v41 }
0x1266   : > { %v3163_v43 = vpop.xlane.xlu0 %3162 }
0x1267   : > { %v3166_v44 = vmul.f32 %v3160_v42, %v3160_v42  ;;  %v3164_v45 = vmul.f32 0.0078125, %v3163_v43  ;;  %v3165_v48 = vsub.f32 %v3155_v26, %v3160_v42 }
0x1269   : > { %v3167_v46 = vsub.f32 %v3164_v45, %v3166_v44 }
0x126b   : > { %v3168_v47 = vadd.f32 1e-05, %v3167_v46 }
0x126d   : > { %4312 = vrsqrt.f32 %v3168_v47 }
0x1277   : > { %v4313_v51 = vpop.eup %4312 }
0x1278   : > { %v3170_v53 = vmul.f32 %v4313_v51, %v3165_v48 }
0x127a   : > { %v3177_v1 = vmul.f32 %v3666_v52, %v3170_v53 }
0x127c   : > { %v3184_v55 = vadd.f32 %v3667_v54, %v3177_v1 }
0x127e   : > { %v3185_v56 = vrot.slane %v3184_v55, 4 }
0x1280   : > { %v3186_v57 = vadd.f32 %v3185_v56, %v3184_v55 }
0x1282   : > { %v3187_v58 = vrot.slane %v3186_v57, 2 }
0x1284   : > { %v3188_v61 = vadd.f32 %v3187_v58, %v3186_v57 }
0x1286   : > { %v3189_v62 = vrot.slane %v3188_v61, 1 }
0x1288   : > { %v3190_v63 = vadd.f32 %v3189_v62, %v3188_v61 }
0x128a   : > { %v3207_v2 = vpack.c.bf16 %v3190_v63, %v3190_v63 }
0x128c   : > { %4003 = vmatmul.mubr.bf16.vlgmr.msra.gmra.mrb[60].mxu1 %v3207_v2 }
0x135f   : > { %v3291_v59 = vpop.f32.mrb[60].mxu1 }
0x1360   : > { %v3292_v31 = vadd.f32 %v3291_v59, %v3208_v4  ;;  %v4004_v50 = vpop.f32.mrb[61].mxu1 }
0x1361   : > { %v3294_v5 = vpop.f32.mrb[62].mxu1 }
0x1362   : > { %v3305_v6 = vpack.c.bf16 %v3292_v31, %v3292_v31  ;;  %v4005_v7 = vpop.f32.mrb[63].mxu1 }
0x1364   : > { %4015 = vmatmul.mubr.msk.bf16.vlgmr.msra.gmra.mrb[44].mxu0 %vm1405_vm4, %v3305_v6 }
0x1437   : > { %v3368_v32 = vpop.f32.mrb[44].mxu0 }
0x1438   : > { %v3369_v34 = vadd.f32 %v3368_v32, %v3306_v25  ;;  %v4016_v8 = vpop.f32.mrb[45].mxu0 }
0x1439   : > { %v3371_v9 = vpop.f32.mrb[46].mxu0 }
0x143a   : > { %v4017_v10 = vpop.f32.mrb[47].mxu0  ;;  %3375 = vst.msk [vmem:[%s663_s4] sm:$0x1] %vm3374_vm6, %v3369_v34 }
0x143b   : > { %4411 = shalt.err (!%p4408_p11)
}
0x143c   : > { %s4412_s17 = scalar_lea.hbm %s5136_s26, 16  ;;  %s4416_s0 = scalar_lea.hbm %s5252_s29, 32 }
0x143d   : > { %p4413_p13 = scmp.ne.s32.totalorder %s5136_s26, %s4412_s17  ;;  %p4417_p6 = scmp.lt.u32.totalorder %s5136_s26, %s5252_s29 }
0x143e   : > { %p4418_p9 = scmp.lt.u32.totalorder %s4416_s0, %s4412_s17  ;;  %p4420_p10 = scmp.lt.u32.totalorder %s4412_s17, %s5136_s26 }
0x143f   : > { %p4414_p5 = pnand %p4413_p13, %p5253_p1 }
0x1440   : > { %p4419_p12 = por %p4418_p9, %p4417_p6 }
0x1441   : > { %p4415_p0 = pneg %p4414_p5 }
0x1442   : > { %p4421_p2 = por %p4420_p10, %p4419_p12 }
0x1444   : > { %p4422_p3 = pnand %p4421_p2, %p4415_p0 }
0x1446   : > { %4425 = shalt.err (!%p4422_p3)
}
0x1447   : > { %4030 = dma.vmem_to_hbm [thread:$0]  (%p5253_p1), %s5138_s1, 16, %s5136_s26, %s3377_s2  }
0x1448 PF: > { %s5254_s3 = sld [smem:[#allocation15_spill]]  ;;  %s5255_s24 = sld [smem:[#allocation12_spill]] }
0x1449   : > { %s5256_s23 = sld [smem:[#allocation19_spill]] }
0x144e   : > { %p4052_p4 = scmp.ge.s32.totalorder %s5254_s3, 2  ;;  %s3401_s27 = sand.u32 1, %s5255_s24  }
0x144f   : > { %p5257_p7 = scmp.ne.s32.totalorder %s5256_s23, 0  ;;  %s3402_s19 = scalar_lea.sflag [#allocation4], %s3401_s27 }
0x1451   : > { %p4043_p8 = pnand %p4052_p4, %p5257_p7 }
0x1453   : > { %4451 = dma.done.wait (!%p4043_p8), %s3402_s19, 16  }
0x1454   : > { %4453 = vsyncadd (!%p4043_p8), %s3402_s19, 4294967280  ;;  %s5258_s24 = sld [smem:[#allocation16_spill]]  ;;  %s5259_s1 = sld [smem:[#allocation13_spill]] }
0x1455   : > { %s5260_s22 = sld [smem:[#allocation14_spill]]  ;;  %s5261_s23 = sld [smem:[#allocation17_spill]] }
0x145a   : > { %p32_p11 = scmp.ge.s32.totalorder %s5258_s24, 4  }
0x145c   :  { %34 = sbr.rel (!%p32_p11) target bundleno = 15 (0xf), region = 160 }
0x1463   :  { %3406 = vsyncpa [#allocation3], 1 }
0x1464   :  { %3408 = vsyncpa [#allocation3 + $0x1], 1 }
0x1465   :  { %3409 = vsyncpa [#allocation6], 1 }
0x1466   :  { %3410 = vsyncpa [#allocation4], 1 }
0x1467   :  { %3412 = vsyncpa [#allocation4 + $0x1], 1 }

</bundles_post_ra>
